<compile_context>
chip_gen: v7x
topology: tpu7x:2x2x1
jax: 0.10.0
libtpu: 0.0.40
codegen_flags: <defaults>
</compile_context>

<pallas_src>
import functools
import math

import jax
import jax.numpy as jnp
from jax import lax
from jax.experimental import pallas as pl
from jax.experimental.pallas import tpu as pltpu


def _round_up(x, m):
    return (x + m - 1) // m * m


def _lstm_kernel(x_ref, wih_ref, whh_ref, bias_ref,      # inputs
                 y_ref, hn_ref, cn_ref,                   # outputs
                 pre_sc, h_sc, c_sc,                      # scratch
                 *, n_sub, t_valid, t_chunk, needs_mask):
    """One grid step == one (batch block, time chunk). Recurrence runs in-kernel."""
    tc = pl.program_id(1)
    B_SUB = 8
    Hp = h_sc.shape[-1]

    @pl.when(tc == 0)
    def _():
        h_sc[...] = jnp.zeros_like(h_sc)
        c_sc[...] = jnp.zeros_like(c_sc)

    # ---- fused input projection for the whole chunk (one MXU matmul) ----------
    # x chunk (T_CHUNK, B_BLK, I) -> (T_CHUNK*B_BLK, I) @ (I, 4*Hp)  + fused bias
    xk = x_ref[...]
    Tc, Bb, In = xk.shape
    pre = jnp.dot(xk.reshape(Tc * Bb, In).astype(jnp.bfloat16), wih_ref[...],
                  preferred_element_type=jnp.float32)
    pre = pre + bias_ref[...]
    pre_sc[...] = pre.reshape(Tc, Bb, 4 * Hp)

    whh = whh_ref[...]                      # (Hp, 4*Hp) f32, hoisted out of the loop
    base_t = tc * t_chunk

    def step(t, carry):
        hs, cs = carry                      # tuples of n_sub (8, Hp) f32 arrays
        gates_row = pre_sc[t]               # (B_BLK, 4*Hp); leading-dim dynamic index
        new_h, new_c = [], []
        for s in range(n_sub):              # interleaved independent sub-tiles:
            h_s, c_s = hs[s], cs[s]         # dot(s) overlaps gate math of s-1
            g = gates_row[s * B_SUB:(s + 1) * B_SUB, :] + jnp.dot(
                h_s, whh, preferred_element_type=jnp.float32)
            # 0.5 pre-scale of i/f/o already folded into W/bias:
            #   sigmoid(z) = 0.5*tanh(0.5*z) + 0.5, and g holds 0.5*z for i/f/o.
            i_g = 0.5 * jnp.tanh(g[:, 0 * Hp:1 * Hp]) + 0.5
            f_g = 0.5 * jnp.tanh(g[:, 1 * Hp:2 * Hp]) + 0.5
            g_g = jnp.tanh(g[:, 2 * Hp:3 * Hp])
            o_g = 0.5 * jnp.tanh(g[:, 3 * Hp:4 * Hp]) + 0.5
            c_n = f_g * c_s + i_g * g_g
            h_n = o_g * jnp.tanh(c_n)
            if needs_mask:                  # masked tail steps (T padded to T_CHUNK)
                valid = (base_t + t) < t_valid
                h_n = jnp.where(valid, h_n, h_s)
                c_n = jnp.where(valid, c_n, c_s)
            new_h.append(h_n)
            new_c.append(c_n)
        h_cat = new_h[0] if n_sub == 1 else jnp.concatenate(new_h, axis=0)
        y_ref[t] = h_cat.astype(y_ref.dtype)            # lane-dense full-slab store
        return tuple(new_h), tuple(new_c)

    h0 = tuple(h_sc[s * B_SUB:(s + 1) * B_SUB, :] for s in range(n_sub))
    c0 = tuple(c_sc[s * B_SUB:(s + 1) * B_SUB, :] for s in range(n_sub))
    hf, cf = lax.fori_loop(0, t_chunk, step, (h0, c0), unroll=True)

    h_fin = hf[0] if n_sub == 1 else jnp.concatenate(hf, axis=0)
    c_fin = cf[0] if n_sub == 1 else jnp.concatenate(cf, axis=0)
    h_sc[...] = h_fin
    c_sc[...] = c_fin

    @pl.when(tc == pl.num_programs(1) - 1)
    def _():
        hn_ref[...] = h_fin.astype(hn_ref.dtype)
        cn_ref[...] = c_fin.astype(cn_ref.dtype)


def lstm_pallas(x_btI, w_ih, w_hh, b_ih, b_hh, *, t_chunk_cap=16):
    """Mimics torch.nn.LSTM(inp, hid, num_layers=1, batch_first=True), zero init state.

    Args:
      x_btI: (B, T, I) float32
      w_ih:  (4H, I), w_hh: (4H, H), b_ih/b_hh: (4H,)   -- PyTorch layout.
    Returns:
      output (B, T, H), (h_n (1, B, H), c_n (1, B, H))
    """
    B, T, I = x_btI.shape
    H = w_hh.shape[1]
    H_pad = _round_up(H, 128)                            # per-gate lane tile

    # ---- batch tiling: 8-row sub-tiles, interleave up to 4 per kernel block,
    #      but keep >= 2 grid blocks along batch when possible (v7x: 2 TCs). ----
    n_sub_total = pl.cdiv(B, 8)
    n_sub = max(1, min(4, n_sub_total // 2)) if n_sub_total >= 2 else 1
    B_BLK = 8 * n_sub
    n_b = pl.cdiv(n_sub_total, n_sub)
    B_pad = n_b * B_BLK

    # ---- time chunk: multiple of 8, bounded by cap and a VMEM budget sized for
    #      v7x's 64 MiB physical VMEM (v5e/v6e have more headroom). ------------
    def vmem_bytes(tcn):
        return (2 * tcn * B_BLK * I * 4            # x blocks (double-buffered)
                + 2 * tcn * B_BLK * H_pad * 4      # y blocks
                + 2 * I * 4 * H_pad * 2            # W_ih (bf16)
                + 2 * H_pad * 4 * H_pad * 4        # W_hh (f32)
                + 2 * 4 * H_pad * 4                # bias
                + tcn * B_BLK * 4 * H_pad * 4      # pre scratch
                + 2 * B_BLK * H_pad * 4            # h/c scratch
                + 4 * B_BLK * H_pad * 4)           # h_n / c_n blocks
    budget = 40 * 1024 * 1024
    T_CHUNK = max(8, min(_round_up(T, 8), _round_up(t_chunk_cap, 8)))
    while T_CHUNK > 8 and vmem_bytes(T_CHUNK) > budget:
        T_CHUNK -= 8
    T_pad = _round_up(T, T_CHUNK)
    n_t = T_pad // T_CHUNK
    needs_mask = (T_pad != T)
    vmem_limit = int(min(max(vmem_bytes(T_CHUNK) * 5 // 4, 32 * 1024 * 1024),
                         100 * 1024 * 1024))

    # ---- weight / bias repacking: gate-major padding to H_pad lanes, with the
    #      0.5 sigmoid pre-scale folded into the i/f/o gate columns. ------------
    def pad_gates(w_t, rows):                            # (rows, 4H) -> (rows, 4*H_pad)
        w3 = w_t.reshape(rows, 4, H)
        scale = jnp.array([0.5, 0.5, 1.0, 0.5], w3.dtype).reshape(1, 4, 1)
        w3 = w3 * scale
        out = jnp.zeros((rows, 4, H_pad), w3.dtype).at[:, :, :H].set(w3)
        return out.reshape(rows, 4 * H_pad)

    wih_p = pad_gates(jnp.transpose(w_ih.astype(jnp.float32), (1, 0)), I)
    wih_bf16 = wih_p.astype(jnp.bfloat16)                # (I, 4*H_pad) MXU operand
    whh_p = pad_gates(jnp.transpose(w_hh.astype(jnp.float32), (1, 0)), H)
    whh_p = jnp.zeros((H_pad, 4 * H_pad), jnp.float32).at[:H, :].set(whh_p)
    bias_p = pad_gates((b_ih + b_hh).astype(jnp.float32).reshape(1, 4 * H), 1)

    # ---- raw x, zero-padded and presented time-major to the kernel (tiny vs the
    #      old 4*H_pad-wide `pre` stream). --------------------------------------
    x_p = jnp.zeros((B_pad, T_pad, I), jnp.float32).at[:B, :T].set(
        x_btI.astype(jnp.float32))
    x_tm = jnp.transpose(x_p, (1, 0, 2))                 # (T_pad, B_pad, I)

    kernel = functools.partial(_lstm_kernel, n_sub=n_sub, t_valid=T,
                               t_chunk=T_CHUNK, needs_mask=needs_mask)

    grid_spec = pltpu.PrefetchScalarGridSpec(
        num_scalar_prefetch=0,
        grid=(n_b, n_t),
        in_specs=[
            pl.BlockSpec((T_CHUNK, B_BLK, I), lambda b, c: (c, b, 0)),       # raw x chunk
            pl.BlockSpec((I, 4 * H_pad), lambda b, c: (0, 0)),               # W_ih^T bf16 (resident)
            pl.BlockSpec((H_pad, 4 * H_pad), lambda b, c: (0, 0)),           # W_hh^T f32 (resident)
            pl.BlockSpec((1, 4 * H_pad), lambda b, c: (0, 0)),               # fused bias
        ],
        out_specs=[
            pl.BlockSpec((T_CHUNK, B_BLK, H_pad), lambda b, c: (c, b, 0)),   # y chunk (time-major)
            pl.BlockSpec((B_BLK, H_pad), lambda b, c: (b, 0)),               # h_n
            pl.BlockSpec((B_BLK, H_pad), lambda b, c: (b, 0)),               # c_n
        ],
        scratch_shapes=[
            pltpu.VMEM((T_CHUNK, B_BLK, 4 * H_pad), jnp.float32),            # chunk pre-activations
            pltpu.VMEM((B_BLK, H_pad), jnp.float32),                         # h carry
            pltpu.VMEM((B_BLK, H_pad), jnp.float32),                         # c carry
        ],
    )

    y_tm, h_n, c_n = pl.pallas_call(
        kernel,
        grid_spec=grid_spec,
        out_shape=(
            jax.ShapeDtypeStruct((T_pad, B_pad, H_pad), jnp.float32),
            jax.ShapeDtypeStruct((B_pad, H_pad), jnp.float32),
            jax.ShapeDtypeStruct((B_pad, H_pad), jnp.float32),
        ),
        compiler_params=pltpu.CompilerParams(
            dimension_semantics=("parallel", "arbitrary"),   # batch ||, time serial
            vmem_limit_bytes=vmem_limit),
    )(x_tm, wih_bf16, whh_p, bias_p)

    y = jnp.transpose(y_tm, (1, 0, 2))[:B, :T, :H]           # back to batch_first
    return y, (h_n[:B, :H][None], c_n[:B, :H][None])


def lstm_reference(x_btI, w_ih, w_hh, b_ih, b_hh):
    """Pure-JAX reference (PyTorch nn.LSTM semantics) for validation."""
    B, T, I = x_btI.shape
    H = w_hh.shape[1]
    bias = b_ih + b_hh

    def step(carry, x_t):
        h, c = carry
        gates = x_t @ w_ih.T + h @ w_hh.T + bias
        i = jax.nn.sigmoid(gates[:, 0 * H:1 * H])
        f = jax.nn.sigmoid(gates[:, 1 * H:2 * H])
        g = jnp.tanh(gates[:, 2 * H:3 * H])
        o = jax.nn.sigmoid(gates[:, 3 * H:4 * H])
        c = f * c + i * g
        h = o * jnp.tanh(c)
        return (h, c), h

    h0 = jnp.zeros((B, H), jnp.float32)
    c0 = jnp.zeros((B, H), jnp.float32)
    (h_n, c_n), y = lax.scan(step, (h0, c0), jnp.transpose(x_btI, (1, 0, 2)))
    return jnp.transpose(y, (1, 0, 2)), (h_n[None], c_n[None])


def _run_case(key, B, T, I, H, t_chunk_cap):
    k_x, k_wih, k_whh, k_bih, k_bhh = jax.random.split(key, 5)
    stdv = 1.0 / math.sqrt(H)                      # PyTorch nn.LSTM default init
    x = jax.random.normal(k_x, (B, T, I), jnp.float32)
    w_ih = jax.random.uniform(k_wih, (4 * H, I), jnp.float32, -stdv, stdv)
    w_hh = jax.random.uniform(k_whh, (4 * H, H), jnp.float32, -stdv, stdv)
    b_ih = jax.random.uniform(k_bih, (4 * H,), jnp.float32, -stdv, stdv)
    b_hh = jax.random.uniform(k_bhh, (4 * H,), jnp.float32, -stdv, stdv)

    fn = jax.jit(functools.partial(lstm_pallas, t_chunk_cap=t_chunk_cap))
    y, (h_n, c_n) = jax.block_until_ready(fn(x, w_ih, w_hh, b_ih, b_hh))
    y_ref, (h_ref, c_ref) = lstm_reference(x, w_ih, w_hh, b_ih, b_hh)

    assert y.shape == (B, T, H) and h_n.shape == (1, B, H) and c_n.shape == (1, B, H)
    # bf16 only on the non-recurrent input projection; recurrence is f32.
    assert jnp.allclose(y, y_ref, atol=1e-2, rtol=1e-2)
    assert jnp.allclose(h_n, h_ref, atol=1e-2, rtol=1e-2)
    assert jnp.allclose(c_n, c_ref, atol=1e-2, rtol=1e-2)


if __name__ == "__main__":
    key = jax.random.PRNGKey(0)
    k1, k2, k3 = jax.random.split(key, 3)

    # RNN('lstm', inp_size=16, hid_size=32, layers=1), batch_first input.
    _run_case(k1, B=2, T=8, I=16, H=32, t_chunk_cap=16)
    # awkward B/T: batch padding, time padding + tail mask, 2 time chunks.
    _run_case(k2, B=3, T=11, I=16, H=32, t_chunk_cap=8)
    # larger batch: 2 interleaved sub-tiles per block, 2 'parallel' grid blocks.
    _run_case(k3, B=32, T=8, I=16, H=32, t_chunk_cap=16)

    print("KERNEL_OK")
</pallas_src>

<mosaic_0001>
module attributes {stable_mosaic.version = 11 : i64} {
  func.func @_lstm_kernel(%arg0: i32, %arg1: i32, %arg2: memref<8x8x16xf32, #tpu.memory_space<vmem>>, %arg3: memref<16x512xbf16, #tpu.memory_space<vmem>>, %arg4: memref<128x512xf32, #tpu.memory_space<vmem>>, %arg5: memref<1x512xf32, #tpu.memory_space<vmem>>, %arg6: memref<8x8x128xf32, #tpu.memory_space<vmem>>, %arg7: memref<8x128xf32, #tpu.memory_space<vmem>>, %arg8: memref<8x128xf32, #tpu.memory_space<vmem>>, %arg9: memref<8x8x512xf32, #tpu.memory_space<vmem>>, %arg10: memref<8x128xf32, #tpu.memory_space<vmem>>, %arg11: memref<8x128xf32, #tpu.memory_space<vmem>>) attributes {dimension_semantics = [#tpu.dimension_semantics<parallel>, #tpu.dimension_semantics<arbitrary>], iteration_bounds = array<i64: 1, 1>, scalar_prefetch = 0 : i64, scratch_operands = 3 : i64, tpu.core_type = #tpu.core_type<tc>, window_params = [{transform_indices = @transform_0, window_bounds = array<i64: 8, 8, 16>}, {pipeline_mode = #tpu.pipeline_mode<synchronous>, transform_indices = @transform_1, window_bounds = array<i64: 16, 512>}, {pipeline_mode = #tpu.pipeline_mode<synchronous>, transform_indices = @transform_2, window_bounds = array<i64: 128, 512>}, {pipeline_mode = #tpu.pipeline_mode<synchronous>, transform_indices = @transform_3, window_bounds = array<i64: 1, 512>}, {transform_indices = @transform_4, window_bounds = array<i64: 8, 8, 128>}, {transform_indices = @transform_5, window_bounds = array<i64: 8, 128>}, {transform_indices = @transform_6, window_bounds = array<i64: 8, 128>}]} {
    %c0_i32 = arith.constant 0 : i32
    %0 = arith.cmpi eq, %arg1, %c0_i32 : i32
    %1 = arith.extui %0 : i1 to i32
    %c0_i32_0 = arith.constant 0 : i32
    %2 = arith.cmpi ne, %1, %c0_i32_0 : i32
    scf.if %2 {
      %cst_111 = arith.constant 0.000000e+00 : f32
      %293 = vector.broadcast %cst_111 : f32 to vector<8x128xf32>
      %c0_112 = arith.constant 0 : index
      %c0_113 = arith.constant 0 : index
      %294 = vector.load %arg10[%c0_112, %c0_113] : memref<8x128xf32, #tpu.memory_space<vmem>>, vector<8x128xf32>
      tpu.vector_store %arg10[%c0_112, %c0_113], %293 {strides = array<i32>} : memref<8x128xf32, #tpu.memory_space<vmem>>, vector<8x128xf32>,
      %cst_114 = arith.constant 0.000000e+00 : f32
      %295 = vector.broadcast %cst_114 : f32 to vector<8x128xf32>
      %c0_115 = arith.constant 0 : index
      %c0_116 = arith.constant 0 : index
      %296 = vector.load %arg11[%c0_115, %c0_116] : memref<8x128xf32, #tpu.memory_space<vmem>>, vector<8x128xf32>
      tpu.vector_store %arg11[%c0_115, %c0_116], %295 {strides = array<i32>} : memref<8x128xf32, #tpu.memory_space<vmem>>, vector<8x128xf32>,
    } else {
    }
    %c0 = arith.constant 0 : index
    %c0_1 = arith.constant 0 : index
    %c0_2 = arith.constant 0 : index
    %3 = vector.load %arg2[%c0, %c0_1, %c0_2] : memref<8x8x16xf32, #tpu.memory_space<vmem>>, vector<8x8x16xf32>
    %4 = vector.shape_cast %3 : vector<8x8x16xf32> to vector<64x16xf32>
    %5 = arith.truncf %4 : vector<64x16xf32> to vector<64x16xbf16>
    %c0_3 = arith.constant 0 : index
    %c0_4 = arith.constant 0 : index
    %6 = vector.load %arg3[%c0_3, %c0_4] : memref<16x512xbf16, #tpu.memory_space<vmem>>, vector<16x512xbf16>
    %cst = arith.constant dense<0.000000e+00> : vector<64x512xf32>
    %7 = tpu.matmul %5, %6, %cst {dimension_numbers = #tpu.dot_dimension_numbers<[1], [0], [0], [1], [0, 0, 1, 1], [], []>} : vector<64x16xbf16>, vector<16x512xbf16>, vector<64x512xf32> -> vector<64x512xf32>
    %c0_5 = arith.constant 0 : index
    %c0_6 = arith.constant 0 : index
    %8 = vector.load %arg5[%c0_5, %c0_6] : memref<1x512xf32, #tpu.memory_space<vmem>>, vector<1x512xf32>
    %9 = vector.broadcast %8 : vector<1x512xf32> to vector<64x512xf32>
    %10 = arith.addf %7, %9 : vector<64x512xf32>
    %11 = vector.shape_cast %10 : vector<64x512xf32> to vector<8x8x512xf32>
    %c0_7 = arith.constant 0 : index
    %c0_8 = arith.constant 0 : index
    %c0_9 = arith.constant 0 : index
    %12 = vector.load %arg9[%c0_7, %c0_8, %c0_9] : memref<8x8x512xf32, #tpu.memory_space<vmem>>, vector<8x8x512xf32>
    tpu.vector_store %arg9[%c0_7, %c0_8, %c0_9], %11 {strides = array<i32>} : memref<8x8x512xf32, #tpu.memory_space<vmem>>, vector<8x8x512xf32>,
    %c0_10 = arith.constant 0 : index
    %c0_11 = arith.constant 0 : index
    %13 = vector.load %arg4[%c0_10, %c0_11] : memref<128x512xf32, #tpu.memory_space<vmem>>, vector<128x512xf32>
    %c0_12 = arith.constant 0 : index
    %c0_13 = arith.constant 0 : index
    %14 = vector.load %arg10[%c0_12, %c0_13] : memref<8x128xf32, #tpu.memory_space<vmem>>, vector<8x128xf32>
    %c0_14 = arith.constant 0 : index
    %c0_15 = arith.constant 0 : index
    %15 = vector.load %arg11[%c0_14, %c0_15] : memref<8x128xf32, #tpu.memory_space<vmem>>, vector<8x128xf32>
    %c0_i32_16 = arith.constant 0 : i32
    %16 = arith.index_cast %c0_i32_16 : i32 to index
    %c0_17 = arith.constant 0 : index
    %c0_18 = arith.constant 0 : index
    %17 = vector.load %arg9[%16, %c0_17, %c0_18] : memref<8x8x512xf32, #tpu.memory_space<vmem>>, vector<1x8x512xf32>
    %18 = vector.shape_cast %17 : vector<1x8x512xf32> to vector<8x512xf32>
    %cst_19 = arith.constant dense<0.000000e+00> : vector<8x512xf32>
    %19 = tpu.matmul %14, %13, %cst_19 {dimension_numbers = #tpu.dot_dimension_numbers<[1], [0], [0], [1], [0, 0, 1, 1], [], []>} : vector<8x128xf32>, vector<128x512xf32>, vector<8x512xf32> -> vector<8x512xf32>
    %20 = arith.addf %18, %19 : vector<8x512xf32>
    %21 = vector.extract_strided_slice %20 {offsets = [0, 0], sizes = [8, 128], strides = [1, 1]} : vector<8x512xf32> to vector<8x128xf32>
    %22 = math.tanh %21 : vector<8x128xf32>
    %cst_20 = arith.constant 5.000000e-01 : f32
    %23 = vector.broadcast %cst_20 : f32 to vector<8x128xf32>
    %24 = arith.mulf %23, %22 : vector<8x128xf32>
    %cst_21 = arith.constant 5.000000e-01 : f32
    %25 = vector.broadcast %cst_21 : f32 to vector<8x128xf32>
    %26 = arith.addf %24, %25 : vector<8x128xf32>
    %27 = vector.extract_strided_slice %20 {offsets = [0, 128], sizes = [8, 128], strides = [1, 1]} : vector<8x512xf32> to vector<8x128xf32>
    %28 = math.tanh %27 : vector<8x128xf32>
    %cst_22 = arith.constant 5.000000e-01 : f32
    %29 = vector.broadcast %cst_22 : f32 to vector<8x128xf32>
    %30 = arith.mulf %29, %28 : vector<8x128xf32>
    %cst_23 = arith.constant 5.000000e-01 : f32
    %31 = vector.broadcast %cst_23 : f32 to vector<8x128xf32>
    %32 = arith.addf %30, %31 : vector<8x128xf32>
    %33 = vector.extract_strided_slice %20 {offsets = [0, 256], sizes = [8, 128], strides = [1, 1]} : vector<8x512xf32> to vector<8x128xf32>
    %34 = math.tanh %33 : vector<8x128xf32>
    %35 = vector.extract_strided_slice %20 {offsets = [0, 384], sizes = [8, 128], strides = [1, 1]} : vector<8x512xf32> to vector<8x128xf32>
    %36 = math.tanh %35 : vector<8x128xf32>
    %cst_24 = arith.constant 5.000000e-01 : f32
    %37 = vector.broadcast %cst_24 : f32 to vector<8x128xf32>
    %38 = arith.mulf %37, %36 : vector<8x128xf32>
    %cst_25 = arith.constant 5.000000e-01 : f32
    %39 = vector.broadcast %cst_25 : f32 to vector<8x128xf32>
    %40 = arith.addf %38, %39 : vector<8x128xf32>
    %41 = arith.mulf %32, %15 : vector<8x128xf32>
    %42 = arith.mulf %26, %34 : vector<8x128xf32>
    %43 = arith.addf %41, %42 : vector<8x128xf32>
    %44 = math.tanh %43 : vector<8x128xf32>
    %45 = arith.mulf %40, %44 : vector<8x128xf32>
    %46 = arith.index_cast %c0_i32_16 : i32 to index
    %c0_26 = arith.constant 0 : index
    %c0_27 = arith.constant 0 : index
    %47 = vector.load %arg6[%46, %c0_26, %c0_27] : memref<8x8x128xf32, #tpu.memory_space<vmem>>, vector<1x8x128xf32>
    %48 = vector.shape_cast %47 : vector<1x8x128xf32> to vector<8x128xf32>
    %49 = vector.shape_cast %45 : vector<8x128xf32> to vector<1x8x128xf32>
    tpu.vector_store %arg6[%46, %c0_26, %c0_27], %49 {strides = array<i32>} : memref<8x8x128xf32, #tpu.memory_space<vmem>>, vector<1x8x128xf32>,
    %c1_i32 = arith.constant 1 : i32
    %50 = arith.index_cast %c1_i32 : i32 to index
    %c0_28 = arith.constant 0 : index
    %c0_29 = arith.constant 0 : index
    %51 = vector.load %arg9[%50, %c0_28, %c0_29] : memref<8x8x512xf32, #tpu.memory_space<vmem>>, vector<1x8x512xf32>
    %52 = vector.shape_cast %51 : vector<1x8x512xf32> to vector<8x512xf32>
    %cst_30 = arith.constant dense<0.000000e+00> : vector<8x512xf32>
    %53 = tpu.matmul %45, %13, %cst_30 {dimension_numbers = #tpu.dot_dimension_numbers<[1], [0], [0], [1], [0, 0, 1, 1], [], []>} : vector<8x128xf32>, vector<128x512xf32>, vector<8x512xf32> -> vector<8x512xf32>
    %54 = arith.addf %52, %53 : vector<8x512xf32>
    %55 = vector.extract_strided_slice %54 {offsets = [0, 0], sizes = [8, 128], strides = [1, 1]} : vector<8x512xf32> to vector<8x128xf32>
    %56 = math.tanh %55 : vector<8x128xf32>
    %cst_31 = arith.constant 5.000000e-01 : f32
    %57 = vector.broadcast %cst_31 : f32 to vector<8x128xf32>
    %58 = arith.mulf %57, %56 : vector<8x128xf32>
    %cst_32 = arith.constant 5.000000e-01 : f32
    %59 = vector.broadcast %cst_32 : f32 to vector<8x128xf32>
    %60 = arith.addf %58, %59 : vector<8x128xf32>
    %61 = vector.extract_strided_slice %54 {offsets = [0, 128], sizes = [8, 128], strides = [1, 1]} : vector<8x512xf32> to vector<8x128xf32>
    %62 = math.tanh %61 : vector<8x128xf32>
    %cst_33 = arith.constant 5.000000e-01 : f32
    %63 = vector.broadcast %cst_33 : f32 to vector<8x128xf32>
    %64 = arith.mulf %63, %62 : vector<8x128xf32>
    %cst_34 = arith.constant 5.000000e-01 : f32
    %65 = vector.broadcast %cst_34 : f32 to vector<8x128xf32>
    %66 = arith.addf %64, %65 : vector<8x128xf32>
    %67 = vector.extract_strided_slice %54 {offsets = [0, 256], sizes = [8, 128], strides = [1, 1]} : vector<8x512xf32> to vector<8x128xf32>
    %68 = math.tanh %67 : vector<8x128xf32>
    %69 = vector.extract_strided_slice %54 {offsets = [0, 384], sizes = [8, 128], strides = [1, 1]} : vector<8x512xf32> to vector<8x128xf32>
    %70 = math.tanh %69 : vector<8x128xf32>
    %cst_35 = arith.constant 5.000000e-01 : f32
    %71 = vector.broadcast %cst_35 : f32 to vector<8x128xf32>
    %72 = arith.mulf %71, %70 : vector<8x128xf32>
    %cst_36 = arith.constant 5.000000e-01 : f32
    %73 = vector.broadcast %cst_36 : f32 to vector<8x128xf32>
    %74 = arith.addf %72, %73 : vector<8x128xf32>
    %75 = arith.mulf %66, %43 : vector<8x128xf32>
    %76 = arith.mulf %60, %68 : vector<8x128xf32>
    %77 = arith.addf %75, %76 : vector<8x128xf32>
    %78 = math.tanh %77 : vector<8x128xf32>
    %79 = arith.mulf %74, %78 : vector<8x128xf32>
    %80 = arith.index_cast %c1_i32 : i32 to index
    %c0_37 = arith.constant 0 : index
    %c0_38 = arith.constant 0 : index
    %81 = vector.load %arg6[%80, %c0_37, %c0_38] : memref<8x8x128xf32, #tpu.memory_space<vmem>>, vector<1x8x128xf32>
    %82 = vector.shape_cast %81 : vector<1x8x128xf32> to vector<8x128xf32>
    %83 = vector.shape_cast %79 : vector<8x128xf32> to vector<1x8x128xf32>
    tpu.vector_store %arg6[%80, %c0_37, %c0_38], %83 {strides = array<i32>} : memref<8x8x128xf32, #tpu.memory_space<vmem>>, vector<1x8x128xf32>,
    %c2_i32 = arith.constant 2 : i32
    %84 = arith.index_cast %c2_i32 : i32 to index
    %c0_39 = arith.constant 0 : index
    %c0_40 = arith.constant 0 : index
    %85 = vector.load %arg9[%84, %c0_39, %c0_40] : memref<8x8x512xf32, #tpu.memory_space<vmem>>, vector<1x8x512xf32>
    %86 = vector.shape_cast %85 : vector<1x8x512xf32> to vector<8x512xf32>
    %cst_41 = arith.constant dense<0.000000e+00> : vector<8x512xf32>
    %87 = tpu.matmul %79, %13, %cst_41 {dimension_numbers = #tpu.dot_dimension_numbers<[1], [0], [0], [1], [0, 0, 1, 1], [], []>} : vector<8x128xf32>, vector<128x512xf32>, vector<8x512xf32> -> vector<8x512xf32>
    %88 = arith.addf %86, %87 : vector<8x512xf32>
    %89 = vector.extract_strided_slice %88 {offsets = [0, 0], sizes = [8, 128], strides = [1, 1]} : vector<8x512xf32> to vector<8x128xf32>
    %90 = math.tanh %89 : vector<8x128xf32>
    %cst_42 = arith.constant 5.000000e-01 : f32
    %91 = vector.broadcast %cst_42 : f32 to vector<8x128xf32>
    %92 = arith.mulf %91, %90 : vector<8x128xf32>
    %cst_43 = arith.constant 5.000000e-01 : f32
    %93 = vector.broadcast %cst_43 : f32 to vector<8x128xf32>
    %94 = arith.addf %92, %93 : vector<8x128xf32>
    %95 = vector.extract_strided_slice %88 {offsets = [0, 128], sizes = [8, 128], strides = [1, 1]} : vector<8x512xf32> to vector<8x128xf32>
    %96 = math.tanh %95 : vector<8x128xf32>
    %cst_44 = arith.constant 5.000000e-01 : f32
    %97 = vector.broadcast %cst_44 : f32 to vector<8x128xf32>
    %98 = arith.mulf %97, %96 : vector<8x128xf32>
    %cst_45 = arith.constant 5.000000e-01 : f32
    %99 = vector.broadcast %cst_45 : f32 to vector<8x128xf32>
    %100 = arith.addf %98, %99 : vector<8x128xf32>
    %101 = vector.extract_strided_slice %88 {offsets = [0, 256], sizes = [8, 128], strides = [1, 1]} : vector<8x512xf32> to vector<8x128xf32>
    %102 = math.tanh %101 : vector<8x128xf32>
    %103 = vector.extract_strided_slice %88 {offsets = [0, 384], sizes = [8, 128], strides = [1, 1]} : vector<8x512xf32> to vector<8x128xf32>
    %104 = math.tanh %103 : vector<8x128xf32>
    %cst_46 = arith.constant 5.000000e-01 : f32
    %105 = vector.broadcast %cst_46 : f32 to vector<8x128xf32>
    %106 = arith.mulf %105, %104 : vector<8x128xf32>
    %cst_47 = arith.constant 5.000000e-01 : f32
    %107 = vector.broadcast %cst_47 : f32 to vector<8x128xf32>
    %108 = arith.addf %106, %107 : vector<8x128xf32>
    %109 = arith.mulf %100, %77 : vector<8x128xf32>
    %110 = arith.mulf %94, %102 : vector<8x128xf32>
    %111 = arith.addf %109, %110 : vector<8x128xf32>
    %112 = math.tanh %111 : vector<8x128xf32>
    %113 = arith.mulf %108, %112 : vector<8x128xf32>
    %114 = arith.index_cast %c2_i32 : i32 to index
    %c0_48 = arith.constant 0 : index
    %c0_49 = arith.constant 0 : index
    %115 = vector.load %arg6[%114, %c0_48, %c0_49] : memref<8x8x128xf32, #tpu.memory_space<vmem>>, vector<1x8x128xf32>
    %116 = vector.shape_cast %115 : vector<1x8x128xf32> to vector<8x128xf32>
    %117 = vector.shape_cast %113 : vector<8x128xf32> to vector<1x8x128xf32>
    tpu.vector_store %arg6[%114, %c0_48, %c0_49], %117 {strides = array<i32>} : memref<8x8x128xf32, #tpu.memory_space<vmem>>, vector<1x8x128xf32>,
    %c3_i32 = arith.constant 3 : i32
    %118 = arith.index_cast %c3_i32 : i32 to index
    %c0_50 = arith.constant 0 : index
    %c0_51 = arith.constant 0 : index
    %119 = vector.load %arg9[%118, %c0_50, %c0_51] : memref<8x8x512xf32, #tpu.memory_space<vmem>>, vector<1x8x512xf32>
    %120 = vector.shape_cast %119 : vector<1x8x512xf32> to vector<8x512xf32>
    %cst_52 = arith.constant dense<0.000000e+00> : vector<8x512xf32>
    %121 = tpu.matmul %113, %13, %cst_52 {dimension_numbers = #tpu.dot_dimension_numbers<[1], [0], [0], [1], [0, 0, 1, 1], [], []>} : vector<8x128xf32>, vector<128x512xf32>, vector<8x512xf32> -> vector<8x512xf32>
    %122 = arith.addf %120, %121 : vector<8x512xf32>
    %123 = vector.extract_strided_slice %122 {offsets = [0, 0], sizes = [8, 128], strides = [1, 1]} : vector<8x512xf32> to vector<8x128xf32>
    %124 = math.tanh %123 : vector<8x128xf32>
    %cst_53 = arith.constant 5.000000e-01 : f32
    %125 = vector.broadcast %cst_53 : f32 to vector<8x128xf32>
    %126 = arith.mulf %125, %124 : vector<8x128xf32>
    %cst_54 = arith.constant 5.000000e-01 : f32
    %127 = vector.broadcast %cst_54 : f32 to vector<8x128xf32>
    %128 = arith.addf %126, %127 : vector<8x128xf32>
    %129 = vector.extract_strided_slice %122 {offsets = [0, 128], sizes = [8, 128], strides = [1, 1]} : vector<8x512xf32> to vector<8x128xf32>
    %130 = math.tanh %129 : vector<8x128xf32>
    %cst_55 = arith.constant 5.000000e-01 : f32
    %131 = vector.broadcast %cst_55 : f32 to vector<8x128xf32>
    %132 = arith.mulf %131, %130 : vector<8x128xf32>
    %cst_56 = arith.constant 5.000000e-01 : f32
    %133 = vector.broadcast %cst_56 : f32 to vector<8x128xf32>
    %134 = arith.addf %132, %133 : vector<8x128xf32>
    %135 = vector.extract_strided_slice %122 {offsets = [0, 256], sizes = [8, 128], strides = [1, 1]} : vector<8x512xf32> to vector<8x128xf32>
    %136 = math.tanh %135 : vector<8x128xf32>
    %137 = vector.extract_strided_slice %122 {offsets = [0, 384], sizes = [8, 128], strides = [1, 1]} : vector<8x512xf32> to vector<8x128xf32>
    %138 = math.tanh %137 : vector<8x128xf32>
    %cst_57 = arith.constant 5.000000e-01 : f32
    %139 = vector.broadcast %cst_57 : f32 to vector<8x128xf32>
    %140 = arith.mulf %139, %138 : vector<8x128xf32>
    %cst_58 = arith.constant 5.000000e-01 : f32
    %141 = vector.broadcast %cst_58 : f32 to vector<8x128xf32>
    %142 = arith.addf %140, %141 : vector<8x128xf32>
    %143 = arith.mulf %134, %111 : vector<8x128xf32>
    %144 = arith.mulf %128, %136 : vector<8x128xf32>
    %145 = arith.addf %143, %144 : vector<8x128xf32>
    %146 = math.tanh %145 : vector<8x128xf32>
    %147 = arith.mulf %142, %146 : vector<8x128xf32>
    %148 = arith.index_cast %c3_i32 : i32 to index
    %c0_59 = arith.constant 0 : index
    %c0_60 = arith.constant 0 : index
    %149 = vector.load %arg6[%148, %c0_59, %c0_60] : memref<8x8x128xf32, #tpu.memory_space<vmem>>, vector<1x8x128xf32>
    %150 = vector.shape_cast %149 : vector<1x8x128xf32> to vector<8x128xf32>
    %151 = vector.shape_cast %147 : vector<8x128xf32> to vector<1x8x128xf32>
    tpu.vector_store %arg6[%148, %c0_59, %c0_60], %151 {strides = array<i32>} : memref<8x8x128xf32, #tpu.memory_space<vmem>>, vector<1x8x128xf32>,
    %c4_i32 = arith.constant 4 : i32
    %152 = arith.index_cast %c4_i32 : i32 to index
    %c0_61 = arith.constant 0 : index
    %c0_62 = arith.constant 0 : index
    %153 = vector.load %arg9[%152, %c0_61, %c0_62] : memref<8x8x512xf32, #tpu.memory_space<vmem>>, vector<1x8x512xf32>
    %154 = vector.shape_cast %153 : vector<1x8x512xf32> to vector<8x512xf32>
    %cst_63 = arith.constant dense<0.000000e+00> : vector<8x512xf32>
    %155 = tpu.matmul %147, %13, %cst_63 {dimension_numbers = #tpu.dot_dimension_numbers<[1], [0], [0], [1], [0, 0, 1, 1], [], []>} : vector<8x128xf32>, vector<128x512xf32>, vector<8x512xf32> -> vector<8x512xf32>
    %156 = arith.addf %154, %155 : vector<8x512xf32>
    %157 = vector.extract_strided_slice %156 {offsets = [0, 0], sizes = [8, 128], strides = [1, 1]} : vector<8x512xf32> to vector<8x128xf32>
    %158 = math.tanh %157 : vector<8x128xf32>
    %cst_64 = arith.constant 5.000000e-01 : f32
    %159 = vector.broadcast %cst_64 : f32 to vector<8x128xf32>
    %160 = arith.mulf %159, %158 : vector<8x128xf32>
    %cst_65 = arith.constant 5.000000e-01 : f32
    %161 = vector.broadcast %cst_65 : f32 to vector<8x128xf32>
    %162 = arith.addf %160, %161 : vector<8x128xf32>
    %163 = vector.extract_strided_slice %156 {offsets = [0, 128], sizes = [8, 128], strides = [1, 1]} : vector<8x512xf32> to vector<8x128xf32>
    %164 = math.tanh %163 : vector<8x128xf32>
    %cst_66 = arith.constant 5.000000e-01 : f32
    %165 = vector.broadcast %cst_66 : f32 to vector<8x128xf32>
    %166 = arith.mulf %165, %164 : vector<8x128xf32>
    %cst_67 = arith.constant 5.000000e-01 : f32
    %167 = vector.broadcast %cst_67 : f32 to vector<8x128xf32>
    %168 = arith.addf %166, %167 : vector<8x128xf32>
    %169 = vector.extract_strided_slice %156 {offsets = [0, 256], sizes = [8, 128], strides = [1, 1]} : vector<8x512xf32> to vector<8x128xf32>
    %170 = math.tanh %169 : vector<8x128xf32>
    %171 = vector.extract_strided_slice %156 {offsets = [0, 384], sizes = [8, 128], strides = [1, 1]} : vector<8x512xf32> to vector<8x128xf32>
    %172 = math.tanh %171 : vector<8x128xf32>
    %cst_68 = arith.constant 5.000000e-01 : f32
    %173 = vector.broadcast %cst_68 : f32 to vector<8x128xf32>
    %174 = arith.mulf %173, %172 : vector<8x128xf32>
    %cst_69 = arith.constant 5.000000e-01 : f32
    %175 = vector.broadcast %cst_69 : f32 to vector<8x128xf32>
    %176 = arith.addf %174, %175 : vector<8x128xf32>
    %177 = arith.mulf %168, %145 : vector<8x128xf32>
    %178 = arith.mulf %162, %170 : vector<8x128xf32>
    %179 = arith.addf %177, %178 : vector<8x128xf32>
    %180 = math.tanh %179 : vector<8x128xf32>
    %181 = arith.mulf %176, %180 : vector<8x128xf32>
    %182 = arith.index_cast %c4_i32 : i32 to index
    %c0_70 = arith.constant 0 : index
    %c0_71 = arith.constant 0 : index
    %183 = vector.load %arg6[%182, %c0_70, %c0_71] : memref<8x8x128xf32, #tpu.memory_space<vmem>>, vector<1x8x128xf32>
    %184 = vector.shape_cast %183 : vector<1x8x128xf32> to vector<8x128xf32>
    %185 = vector.shape_cast %181 : vector<8x128xf32> to vector<1x8x128xf32>
    tpu.vector_store %arg6[%182, %c0_70, %c0_71], %185 {strides = array<i32>} : memref<8x8x128xf32, #tpu.memory_space<vmem>>, vector<1x8x128xf32>,
    %c5_i32 = arith.constant 5 : i32
    %186 = arith.index_cast %c5_i32 : i32 to index
    %c0_72 = arith.constant 0 : index
    %c0_73 = arith.constant 0 : index
    %187 = vector.load %arg9[%186, %c0_72, %c0_73] : memref<8x8x512xf32, #tpu.memory_space<vmem>>, vector<1x8x512xf32>
    %188 = vector.shape_cast %187 : vector<1x8x512xf32> to vector<8x512xf32>
    %cst_74 = arith.constant dense<0.000000e+00> : vector<8x512xf32>
    %189 = tpu.matmul %181, %13, %cst_74 {dimension_numbers = #tpu.dot_dimension_numbers<[1], [0], [0], [1], [0, 0, 1, 1], [], []>} : vector<8x128xf32>, vector<128x512xf32>, vector<8x512xf32> -> vector<8x512xf32>
    %190 = arith.addf %188, %189 : vector<8x512xf32>
    %191 = vector.extract_strided_slice %190 {offsets = [0, 0], sizes = [8, 128], strides = [1, 1]} : vector<8x512xf32> to vector<8x128xf32>
    %192 = math.tanh %191 : vector<8x128xf32>
    %cst_75 = arith.constant 5.000000e-01 : f32
    %193 = vector.broadcast %cst_75 : f32 to vector<8x128xf32>
    %194 = arith.mulf %193, %192 : vector<8x128xf32>
    %cst_76 = arith.constant 5.000000e-01 : f32
    %195 = vector.broadcast %cst_76 : f32 to vector<8x128xf32>
    %196 = arith.addf %194, %195 : vector<8x128xf32>
    %197 = vector.extract_strided_slice %190 {offsets = [0, 128], sizes = [8, 128], strides = [1, 1]} : vector<8x512xf32> to vector<8x128xf32>
    %198 = math.tanh %197 : vector<8x128xf32>
    %cst_77 = arith.constant 5.000000e-01 : f32
    %199 = vector.broadcast %cst_77 : f32 to vector<8x128xf32>
    %200 = arith.mulf %199, %198 : vector<8x128xf32>
    %cst_78 = arith.constant 5.000000e-01 : f32
    %201 = vector.broadcast %cst_78 : f32 to vector<8x128xf32>
    %202 = arith.addf %200, %201 : vector<8x128xf32>
    %203 = vector.extract_strided_slice %190 {offsets = [0, 256], sizes = [8, 128], strides = [1, 1]} : vector<8x512xf32> to vector<8x128xf32>
    %204 = math.tanh %203 : vector<8x128xf32>
    %205 = vector.extract_strided_slice %190 {offsets = [0, 384], sizes = [8, 128], strides = [1, 1]} : vector<8x512xf32> to vector<8x128xf32>
    %206 = math.tanh %205 : vector<8x128xf32>
    %cst_79 = arith.constant 5.000000e-01 : f32
    %207 = vector.broadcast %cst_79 : f32 to vector<8x128xf32>
    %208 = arith.mulf %207, %206 : vector<8x128xf32>
    %cst_80 = arith.constant 5.000000e-01 : f32
    %209 = vector.broadcast %cst_80 : f32 to vector<8x128xf32>
    %210 = arith.addf %208, %209 : vector<8x128xf32>
    %211 = arith.mulf %202, %179 : vector<8x128xf32>
    %212 = arith.mulf %196, %204 : vector<8x128xf32>
    %213 = arith.addf %211, %212 : vector<8x128xf32>
    %214 = math.tanh %213 : vector<8x128xf32>
    %215 = arith.mulf %210, %214 : vector<8x128xf32>
    %216 = arith.index_cast %c5_i32 : i32 to index
    %c0_81 = arith.constant 0 : index
    %c0_82 = arith.constant 0 : index
    %217 = vector.load %arg6[%216, %c0_81, %c0_82] : memref<8x8x128xf32, #tpu.memory_space<vmem>>, vector<1x8x128xf32>
    %218 = vector.shape_cast %217 : vector<1x8x128xf32> to vector<8x128xf32>
    %219 = vector.shape_cast %215 : vector<8x128xf32> to vector<1x8x128xf32>
    tpu.vector_store %arg6[%216, %c0_81, %c0_82], %219 {strides = array<i32>} : memref<8x8x128xf32, #tpu.memory_space<vmem>>, vector<1x8x128xf32>,
    %c6_i32 = arith.constant 6 : i32
    %220 = arith.index_cast %c6_i32 : i32 to index
    %c0_83 = arith.constant 0 : index
    %c0_84 = arith.constant 0 : index
    %221 = vector.load %arg9[%220, %c0_83, %c0_84] : memref<8x8x512xf32, #tpu.memory_space<vmem>>, vector<1x8x512xf32>
    %222 = vector.shape_cast %221 : vector<1x8x512xf32> to vector<8x512xf32>
    %cst_85 = arith.constant dense<0.000000e+00> : vector<8x512xf32>
    %223 = tpu.matmul %215, %13, %cst_85 {dimension_numbers = #tpu.dot_dimension_numbers<[1], [0], [0], [1], [0, 0, 1, 1], [], []>} : vector<8x128xf32>, vector<128x512xf32>, vector<8x512xf32> -> vector<8x512xf32>
    %224 = arith.addf %222, %223 : vector<8x512xf32>
    %225 = vector.extract_strided_slice %224 {offsets = [0, 0], sizes = [8, 128], strides = [1, 1]} : vector<8x512xf32> to vector<8x128xf32>
    %226 = math.tanh %225 : vector<8x128xf32>
    %cst_86 = arith.constant 5.000000e-01 : f32
    %227 = vector.broadcast %cst_86 : f32 to vector<8x128xf32>
    %228 = arith.mulf %227, %226 : vector<8x128xf32>
    %cst_87 = arith.constant 5.000000e-01 : f32
    %229 = vector.broadcast %cst_87 : f32 to vector<8x128xf32>
    %230 = arith.addf %228, %229 : vector<8x128xf32>
    %231 = vector.extract_strided_slice %224 {offsets = [0, 128], sizes = [8, 128], strides = [1, 1]} : vector<8x512xf32> to vector<8x128xf32>
    %232 = math.tanh %231 : vector<8x128xf32>
    %cst_88 = arith.constant 5.000000e-01 : f32
    %233 = vector.broadcast %cst_88 : f32 to vector<8x128xf32>
    %234 = arith.mulf %233, %232 : vector<8x128xf32>
    %cst_89 = arith.constant 5.000000e-01 : f32
    %235 = vector.broadcast %cst_89 : f32 to vector<8x128xf32>
    %236 = arith.addf %234, %235 : vector<8x128xf32>
    %237 = vector.extract_strided_slice %224 {offsets = [0, 256], sizes = [8, 128], strides = [1, 1]} : vector<8x512xf32> to vector<8x128xf32>
    %238 = math.tanh %237 : vector<8x128xf32>
    %239 = vector.extract_strided_slice %224 {offsets = [0, 384], sizes = [8, 128], strides = [1, 1]} : vector<8x512xf32> to vector<8x128xf32>
    %240 = math.tanh %239 : vector<8x128xf32>
    %cst_90 = arith.constant 5.000000e-01 : f32
    %241 = vector.broadcast %cst_90 : f32 to vector<8x128xf32>
    %242 = arith.mulf %241, %240 : vector<8x128xf32>
    %cst_91 = arith.constant 5.000000e-01 : f32
    %243 = vector.broadcast %cst_91 : f32 to vector<8x128xf32>
    %244 = arith.addf %242, %243 : vector<8x128xf32>
    %245 = arith.mulf %236, %213 : vector<8x128xf32>
    %246 = arith.mulf %230, %238 : vector<8x128xf32>
    %247 = arith.addf %245, %246 : vector<8x128xf32>
    %248 = math.tanh %247 : vector<8x128xf32>
    %249 = arith.mulf %244, %248 : vector<8x128xf32>
    %250 = arith.index_cast %c6_i32 : i32 to index
    %c0_92 = arith.constant 0 : index
    %c0_93 = arith.constant 0 : index
    %251 = vector.load %arg6[%250, %c0_92, %c0_93] : memref<8x8x128xf32, #tpu.memory_space<vmem>>, vector<1x8x128xf32>
    %252 = vector.shape_cast %251 : vector<1x8x128xf32> to vector<8x128xf32>
    %253 = vector.shape_cast %249 : vector<8x128xf32> to vector<1x8x128xf32>
    tpu.vector_store %arg6[%250, %c0_92, %c0_93], %253 {strides = array<i32>} : memref<8x8x128xf32, #tpu.memory_space<vmem>>, vector<1x8x128xf32>,
    %c7_i32 = arith.constant 7 : i32
    %254 = arith.index_cast %c7_i32 : i32 to index
    %c0_94 = arith.constant 0 : index
    %c0_95 = arith.constant 0 : index
    %255 = vector.load %arg9[%254, %c0_94, %c0_95] : memref<8x8x512xf32, #tpu.memory_space<vmem>>, vector<1x8x512xf32>
    %256 = vector.shape_cast %255 : vector<1x8x512xf32> to vector<8x512xf32>
    %cst_96 = arith.constant dense<0.000000e+00> : vector<8x512xf32>
    %257 = tpu.matmul %249, %13, %cst_96 {dimension_numbers = #tpu.dot_dimension_numbers<[1], [0], [0], [1], [0, 0, 1, 1], [], []>} : vector<8x128xf32>, vector<128x512xf32>, vector<8x512xf32> -> vector<8x512xf32>
    %258 = arith.addf %256, %257 : vector<8x512xf32>
    %259 = vector.extract_strided_slice %258 {offsets = [0, 0], sizes = [8, 128], strides = [1, 1]} : vector<8x512xf32> to vector<8x128xf32>
    %260 = math.tanh %259 : vector<8x128xf32>
    %cst_97 = arith.constant 5.000000e-01 : f32
    %261 = vector.broadcast %cst_97 : f32 to vector<8x128xf32>
    %262 = arith.mulf %261, %260 : vector<8x128xf32>
    %cst_98 = arith.constant 5.000000e-01 : f32
    %263 = vector.broadcast %cst_98 : f32 to vector<8x128xf32>
    %264 = arith.addf %262, %263 : vector<8x128xf32>
    %265 = vector.extract_strided_slice %258 {offsets = [0, 128], sizes = [8, 128], strides = [1, 1]} : vector<8x512xf32> to vector<8x128xf32>
    %266 = math.tanh %265 : vector<8x128xf32>
    %cst_99 = arith.constant 5.000000e-01 : f32
    %267 = vector.broadcast %cst_99 : f32 to vector<8x128xf32>
    %268 = arith.mulf %267, %266 : vector<8x128xf32>
    %cst_100 = arith.constant 5.000000e-01 : f32
    %269 = vector.broadcast %cst_100 : f32 to vector<8x128xf32>
    %270 = arith.addf %268, %269 : vector<8x128xf32>
    %271 = vector.extract_strided_slice %258 {offsets = [0, 256], sizes = [8, 128], strides = [1, 1]} : vector<8x512xf32> to vector<8x128xf32>
    %272 = math.tanh %271 : vector<8x128xf32>
    %273 = vector.extract_strided_slice %258 {offsets = [0, 384], sizes = [8, 128], strides = [1, 1]} : vector<8x512xf32> to vector<8x128xf32>
    %274 = math.tanh %273 : vector<8x128xf32>
    %cst_101 = arith.constant 5.000000e-01 : f32
    %275 = vector.broadcast %cst_101 : f32 to vector<8x128xf32>
    %276 = arith.mulf %275, %274 : vector<8x128xf32>
    %cst_102 = arith.constant 5.000000e-01 : f32
    %277 = vector.broadcast %cst_102 : f32 to vector<8x128xf32>
    %278 = arith.addf %276, %277 : vector<8x128xf32>
    %279 = arith.mulf %270, %247 : vector<8x128xf32>
    %280 = arith.mulf %264, %272 : vector<8x128xf32>
    %281 = arith.addf %279, %280 : vector<8x128xf32>
    %282 = math.tanh %281 : vector<8x128xf32>
    %283 = arith.mulf %278, %282 : vector<8x128xf32>
    %284 = arith.index_cast %c7_i32 : i32 to index
    %c0_103 = arith.constant 0 : index
    %c0_104 = arith.constant 0 : index
    %285 = vector.load %arg6[%284, %c0_103, %c0_104] : memref<8x8x128xf32, #tpu.memory_space<vmem>>, vector<1x8x128xf32>
    %286 = vector.shape_cast %285 : vector<1x8x128xf32> to vector<8x128xf32>
    %287 = vector.shape_cast %283 : vector<8x128xf32> to vector<1x8x128xf32>
    tpu.vector_store %arg6[%284, %c0_103, %c0_104], %287 {strides = array<i32>} : memref<8x8x128xf32, #tpu.memory_space<vmem>>, vector<1x8x128xf32>,
    %c8_i32 = arith.constant 8 : i32
    %c0_105 = arith.constant 0 : index
    %c0_106 = arith.constant 0 : index
    %288 = vector.load %arg10[%c0_105, %c0_106] : memref<8x128xf32, #tpu.memory_space<vmem>>, vector<8x128xf32>
    tpu.vector_store %arg10[%c0_105, %c0_106], %283 {strides = array<i32>} : memref<8x128xf32, #tpu.memory_space<vmem>>, vector<8x128xf32>,
    %c0_107 = arith.constant 0 : index
    %c0_108 = arith.constant 0 : index
    %289 = vector.load %arg11[%c0_107, %c0_108] : memref<8x128xf32, #tpu.memory_space<vmem>>, vector<8x128xf32>
    tpu.vector_store %arg11[%c0_107, %c0_108], %281 {strides = array<i32>} : memref<8x128xf32, #tpu.memory_space<vmem>>, vector<8x128xf32>,
    %c0_i32_109 = arith.constant 0 : i32
    %290 = arith.cmpi eq, %arg1, %c0_i32_109 : i32
    %291 = arith.extui %290 : i1 to i32
    %c0_i32_110 = arith.constant 0 : i32
    %292 = arith.cmpi ne, %291, %c0_i32_110 : i32
    scf.if %292 {
      %c0_111 = arith.constant 0 : index
      %c0_112 = arith.constant 0 : index
      %293 = vector.load %arg7[%c0_111, %c0_112] : memref<8x128xf32, #tpu.memory_space<vmem>>, vector<8x128xf32>
      tpu.vector_store %arg7[%c0_111, %c0_112], %283 {strides = array<i32>} : memref<8x128xf32, #tpu.memory_space<vmem>>, vector<8x128xf32>,
      %c0_113 = arith.constant 0 : index
      %c0_114 = arith.constant 0 : index
      %294 = vector.load %arg8[%c0_113, %c0_114] : memref<8x128xf32, #tpu.memory_space<vmem>>, vector<8x128xf32>
      tpu.vector_store %arg8[%c0_113, %c0_114], %281 {strides = array<i32>} : memref<8x128xf32, #tpu.memory_space<vmem>>, vector<8x128xf32>,
    } else {
    }
    return
  }
  func.func @transform_0(%arg0: i32, %arg1: i32) -> (i32, i32, i32) {
    %c0_i32 = arith.constant 0 : i32
    %c0_i32_0 = arith.constant 0 : i32
    return %arg1, %arg0, %c0_i32 : i32, i32, i32
  }
  func.func @transform_1(%arg0: i32, %arg1: i32) -> (i32, i32) {
    %c0_i32 = arith.constant 0 : i32
    %c0_i32_0 = arith.constant 0 : i32
    %c0_i32_1 = arith.constant 0 : i32
    return %c0_i32, %c0_i32_0 : i32, i32
  }
  func.func @transform_2(%arg0: i32, %arg1: i32) -> (i32, i32) {
    %c0_i32 = arith.constant 0 : i32
    %c0_i32_0 = arith.constant 0 : i32
    %c0_i32_1 = arith.constant 0 : i32
    return %c0_i32, %c0_i32_0 : i32, i32
  }
  func.func @transform_3(%arg0: i32, %arg1: i32) -> (i32, i32) {
    %c0_i32 = arith.constant 0 : i32
    %c0_i32_0 = arith.constant 0 : i32
    %c0_i32_1 = arith.constant 0 : i32
    return %c0_i32, %c0_i32_0 : i32, i32
  }
  func.func @transform_4(%arg0: i32, %arg1: i32) -> (i32, i32, i32) {
    %c0_i32 = arith.constant 0 : i32
    %c0_i32_0 = arith.constant 0 : i32
    return %arg1, %arg0, %c0_i32 : i32, i32, i32
  }
  func.func @transform_5(%arg0: i32, %arg1: i32) -> (i32, i32) {
    %c0_i32 = arith.constant 0 : i32
    %c0_i32_0 = arith.constant 0 : i32
    return %arg0, %c0_i32 : i32, i32
  }
  func.func @transform_6(%arg0: i32, %arg1: i32) -> (i32, i32) {
    %c0_i32 = arith.constant 0 : i32
    %c0_i32_0 = arith.constant 0 : i32
    return %arg0, %c0_i32 : i32, i32
  }
}

</mosaic_0001>

<bundles_post_ra>
// kernel: lstm_pallas.1
= control target key start
LH: loop header
LB: loop body
LE: loop exit
PB: predicated region body
PF: predicated region fallthrough
CT: control target
= control target key end

     0   :  { %v2322_v1 = vmov 0   ;;  %vm85_vm0 = vcmask 130048   ;;  %s3104_s1 = inlined_call_operand.vmem [shape: bf16[16,512], index: 1, kind: input, shape index: {}]   ;;  %s3105_s0 = inlined_call_operand.vmem [shape: f32[8,8,16], index: 0, kind: input, shape index: {}]   ;;  %s3106_s2 = inlined_call_operand.vmem [shape: f32[128,512], index: 2, kind: input, shape index: {}]   ;;  %s3107_s3 = inlined_call_operand.vmem [shape: f32[1,512], index: 3, kind: input, shape index: {}]   ;;  %s3108_s4 = inlined_call_operand.vmem [shape: f32[8,8,128], index: 4, kind: output, shape index: {0}]   ;;  %s3109_s6 = inlined_call_operand.vmem [shape: f32[8,128], index: 6, kind: output, shape index: {2}]   ;;  %s3110_s5 = inlined_call_operand.vmem [shape: f32[8,128], index: 5, kind: output, shape index: {1}]  }
   0x1   :  { %v2236_v0 = vld [vmem:[%s3104_s1 + $0x4] ss:$16 sps:$4 sm:$0xff]   ;;  %130 = vmatprep.mubr.bf16.mxu0 %v2322_v1  ;;  %203 = vmatprep.mubr.bf16.mxu1 %v2322_v1  ;;  %v2238_v2 = vld [vmem:[%s3104_s1 + $0xc] ss:$16 sps:$4 sm:$0xff]   ;;  %v2240_v3 = vld [vmem:[%s3104_s1] ss:$16 sps:$4 sm:$0xff]  }
   0x2   :  { %98 = vmatprep.subr.bf16.mxu0 %v2236_v0  ;;  %v2241_v4 = vld [vmem:[%s3104_s1 + $0x8] ss:$16 sps:$4 sm:$0xff]   ;;  %v27_v5 = vld [vmem:[%s3105_s0] sm:$0xff]  ;;  %171 = vmatprep.subr.bf16.mxu1 %v2238_v2  ;;  %v278_v16 = vld [vmem:[%s3106_s2 + $0x10] sm:$0xff] }
   0x3   :  { %v28_v6 = vld [vmem:[%s3105_s0 + $0x8] sm:$0xff]  ;;  %99 = vmatpush1.bf16.msra.mxu0 %v2240_v3  ;;  %172 = vmatpush1.bf16.msra.mxu1 %v2241_v4  ;;  %v279_v11 = vld [vmem:[%s3106_s2 + $0x18] sm:$0xff]  ;;  %v276_v13 = vld [vmem:[%s3106_s2] sm:$0xff] }
   0x4   :  { %v277_v7 = vld [vmem:[%s3106_s2 + $0x8] sm:$0xff]  ;;  %v35_v9 = vpack.c.bf16 %v28_v6, %v27_v5  ;;  %v283_v12 = vld [vmem:[%s3106_s2 + $0x38] sm:$0xff]  ;;  %v280_v15 = vld [vmem:[%s3106_s2 + $0x20] sm:$0xff] }
   0x5   :  { %v281_v8 = vld [vmem:[%s3106_s2 + $0x28] sm:$0xff]  ;;  %v2396_v14 = vpack.c.bf16 %v283_v12, %v279_v11  ;;  %v282_v17 = vld [vmem:[%s3106_s2 + $0x30] sm:$0xff]  ;;  %v2408_v18 = vpack.c.bf16 %v280_v15, %v276_v13  ;;  %v287_v22 = vld [vmem:[%s3106_s2 + $0x58] sm:$0xff] }
   0x6   :  { %v2385_v10 = vpack.c.bf16 %v281_v8, %v277_v7  ;;  %v2410_v19 = vpack.c.bf16 %v282_v17, %v278_v16  ;;  %v285_v20 = vld [vmem:[%s3106_s2 + $0x48] sm:$0xff]  ;;  %1707 = vmatmul.mubr.msk.bf16.vlgmr.msra.gmra.mrb[0].mxu0 %vm85_vm0, %v35_v9  ;;  %1711 = vmatmul.mubr.msk.bf16.vlgmr.msra.gmra.mrb[0].mxu1 %vm85_vm0, %v35_v9  ;;  %v291_v24 = vld [vmem:[%s3106_s2 + $0x78] sm:$0xff]  ;;  %v284_v25 = vld [vmem:[%s3106_s2 + $0x40] sm:$0xff] }
   0x7   :  { %v289_v21 = vld [vmem:[%s3106_s2 + $0x68] sm:$0xff]  ;;  %v288_v26 = vld [vmem:[%s3106_s2 + $0x60] sm:$0xff]  ;;  %1755 = vmatprep.subr.bf16.mxu1 %v2396_v14  ;;  %v2436_v27 = vpack.c.bf16 %v291_v24, %v287_v22  ;;  %v286_v29 = vld [vmem:[%s3106_s2 + $0x50] sm:$0xff]  ;;  %140 = vmatprep.mubr.bf16.mxu0 %v2322_v1 }
   0x8   :  { %1723 = vmatprep.subr.bf16.mxu0 %v2385_v10  ;;  %v2423_v23 = vpack.c.bf16 %v289_v21, %v285_v20  ;;  %v2438_v28 = vpack.c.bf16 %v288_v26, %v284_v25  ;;  %v290_v30 = vld [vmem:[%s3106_s2 + $0x70] sm:$0xff]  ;;  %1757 = vmatpush1.bf16.msra.mxu1 %v2410_v19  ;;  %v30_v33 = vld [vmem:[%s3105_s0 + $0x18] sm:$0xff]  ;;  %v293_v34 = vld [vmem:[%s3106_s2 + $0x88] sm:$0xff] }
   0x9   :  { %1725 = vmatpush1.bf16.msra.mxu0 %v2408_v18  ;;  %v29_v31 = vld [vmem:[%s3105_s0 + $0x10] sm:$0xff]  ;;  %v2451_v32 = vpack.c.bf16 %v290_v30, %v286_v29  ;;  %v297_v35 = vld [vmem:[%s3106_s2 + $0xa8] sm:$0xff]  ;;  %1759 = vmatprep.subr.bf16.mxu1 %v2436_v27  ;;  %v295_v37 = vld [vmem:[%s3106_s2 + $0x98] sm:$0xff] }
   0xa   :  { %1727 = vmatprep.subr.bf16.mxu0 %v2423_v23  ;;  %v2464_v36 = vpack.c.bf16 %v297_v35, %v293_v34  ;;  %v299_v38 = vld [vmem:[%s3106_s2 + $0xb8] sm:$0xff]  ;;  %v292_v39 = vld [vmem:[%s3106_s2 + $0x80] sm:$0xff]  ;;  %213 = vmatprep.mubr.bf16.mxu1 %v2322_v1  ;;  %v36_v40 = vpack.c.bf16 %v30_v33, %v29_v31  ;;  %v294_v43 = vld [vmem:[%s3106_s2 + $0x90] sm:$0xff] }
   0xb   :  { %v2476_v41 = vpack.c.bf16 %v299_v38, %v295_v37  ;;  %v296_v42 = vld [vmem:[%s3106_s2 + $0xa0] sm:$0xff]  ;;  %v298_v44 = vld [vmem:[%s3106_s2 + $0xb0] sm:$0xff]  ;;  %v301_v46 = vld [vmem:[%s3106_s2 + $0xc8] sm:$0xff] }
   0xc   :  { %v2488_v45 = vpack.c.bf16 %v296_v42, %v292_v39  ;;  %v305_v47 = vld [vmem:[%s3106_s2 + $0xe8] sm:$0xff]  ;;  %v303_v48 = vld [vmem:[%s3106_s2 + $0xd8] sm:$0xff]  ;;  %1761 = vmatpush1.bf16.msra.mxu1 %v2451_v32  ;;  %v2501_v49 = vpack.c.bf16 %v298_v44, %v294_v43  ;;  %v300_v52 = vld [vmem:[%s3106_s2 + $0xc0] sm:$0xff] }
   0xd   :  { %1729 = vmatpush1.bf16.msra.mxu0 %v2438_v28  ;;  %v2503_v50 = vpack.c.bf16 %v305_v47, %v301_v46  ;;  %v307_v51 = vld [vmem:[%s3106_s2 + $0xf8] sm:$0xff]  ;;  %v304_v53 = vld [vmem:[%s3106_s2 + $0xe0] sm:$0xff]  ;;  %1763 = vmatprep.subr.bf16.mxu1 %v2476_v41  ;;  %v302_v55 = vld [vmem:[%s3106_s2 + $0xd0] sm:$0xff] }
   0xe   :  { %1731 = vmatprep.subr.bf16.mxu0 %v2464_v36  ;;  %v2515_v54 = vpack.c.bf16 %v307_v51, %v303_v48  ;;  %v306_v56 = vld [vmem:[%s3106_s2 + $0xf0] sm:$0xff]  ;;  %1708 = vmatmul.mubr.msk.bf16.gmra.mrb[4].mxu0 %vm85_vm0, %v36_v40  ;;  %v31_v57 = vld [vmem:[%s3105_s0 + $0x20] sm:$0xff]  ;;  %v309_v58 = vld [vmem:[%s3106_s2 + $0x108] sm:$0xff]  ;;  %v2535_v60 = vpack.c.bf16 %v304_v53, %v300_v52 }
   0xf   :  { %1712 = vmatmul.mubr.msk.bf16.gmra.mrb[4].mxu1 %vm85_vm0, %v36_v40  ;;  %v313_v59 = vld [vmem:[%s3106_s2 + $0x128] sm:$0xff]  ;;  %150 = vmatprep.mubr.bf16.mxu0 %v2322_v1  ;;  %v311_v62 = vld [vmem:[%s3106_s2 + $0x118] sm:$0xff]  ;;  %v2549_v0 = vpack.c.bf16 %v306_v56, %v302_v55  ;;  %v308_v3 = vld [vmem:[%s3106_s2 + $0x100] sm:$0xff] }
  0x10   :  { %v32_v61 = vld [vmem:[%s3105_s0 + $0x28] sm:$0xff]  ;;  %v315_v63 = vld [vmem:[%s3106_s2 + $0x138] sm:$0xff]  ;;  %1765 = vmatpush1.bf16.msra.mxu1 %v2501_v49  ;;  %v2551_v2 = vpack.c.bf16 %v313_v59, %v309_v58  ;;  %v312_v4 = vld [vmem:[%s3106_s2 + $0x120] sm:$0xff]  ;;  %223 = vmatprep.mubr.bf16.mxu1 %v2322_v1 }
  0x11   :  { %1733 = vmatpush1.bf16.msra.mxu0 %v2488_v45  ;;  %v310_v5 = vld [vmem:[%s3106_s2 + $0x110] sm:$0xff]  ;;  %1767 = vmatprep.subr.bf16.mxu1 %v2515_v54  ;;  %v2564_v6 = vpack.c.bf16 %v315_v63, %v311_v62  ;;  %v317_v8 = vld [vmem:[%s3106_s2 + $0x148] sm:$0xff]  ;;  %v37_v11 = vpack.c.bf16 %v32_v61, %v31_v57  ;;  %v319_v12 = vld [vmem:[%s3106_s2 + $0x158] sm:$0xff]  ;;  %v2582_v15 = vpack.c.bf16 %v312_v4, %v308_v3  ;;  %v3111_v63 = vmov 0.0  }
  0x12   :  { %1735 = vmatprep.subr.bf16.mxu0 %v2503_v50  ;;  %v314_v7 = vld [vmem:[%s3106_s2 + $0x130] sm:$0xff]  ;;  %v321_v9 = vld [vmem:[%s3106_s2 + $0x168] sm:$0xff]  ;;  %v323_v13 = vld [vmem:[%s3106_s2 + $0x178] sm:$0xff]  ;;  %v45_v4 = vlaneseq }
  0x13   :  { %v2586_v16 = vpack.c.bf16 %v314_v7, %v310_v5  ;;  %v2588_v17 = vpack.c.bf16 %v321_v9, %v317_v8  ;;  %v316_v20 = vld [vmem:[%s3106_s2 + $0x140] sm:$0xff]  ;;  %v318_v22 = vld [vmem:[%s3106_s2 + $0x150] sm:$0xff]  ;;  %v2600_v24 = vpack.c.bf16 %v323_v13, %v319_v12  ;;  %v325_v26 = vld [vmem:[%s3106_s2 + $0x188] sm:$0xff] }
  0x14   :  { %1769 = vmatpush1.bf16.msra.mxu1 %v2549_v0  ;;  %v320_v21 = vld [vmem:[%s3106_s2 + $0x160] sm:$0xff]  ;;  %v322_v25 = vld [vmem:[%s3106_s2 + $0x170] sm:$0xff]  ;;  %v329_v29 = vld [vmem:[%s3106_s2 + $0x1a8] sm:$0xff]  ;;  %v46_v5 = vshrl.u32 %v45_v4, 7 }
  0x15   :  { %1737 = vmatpush1.bf16.msra.mxu0 %v2535_v60  ;;  %1771 = vmatprep.subr.bf16.mxu1 %v2564_v6  ;;  %v327_v30 = vld [vmem:[%s3106_s2 + $0x198] sm:$0xff]  ;;  %v2620_v33 = vpack.c.bf16 %v320_v21, %v316_v20  ;;  %v33_v34 = vld [vmem:[%s3105_s0 + $0x30] sm:$0xff]  ;;  %v2631_v37 = vpack.c.bf16 %v322_v25, %v318_v22  ;;  %v2633_v38 = vpack.c.bf16 %v329_v29, %v325_v26  ;;  %v324_v39 = vld [vmem:[%s3106_s2 + $0x180] sm:$0xff] }
  0x16   :  { %1739 = vmatprep.subr.bf16.mxu0 %v2551_v2  ;;  %1709 = vmatmul.mubr.msk.bf16.gmra.mrb[8].mxu0 %vm85_vm0, %v37_v11  ;;  %v331_v31 = vld [vmem:[%s3106_s2 + $0x1b8] sm:$0xff]  ;;  %v328_v40 = vld [vmem:[%s3106_s2 + $0x1a0] sm:$0xff]  ;;  %v326_v42 = vld [vmem:[%s3106_s2 + $0x190] sm:$0xff]  ;;  %v55_v7 = vsub.s32 2, %v46_v5  ;;  %v59_v8 = vsub.s32 3, %v46_v5  ;;  %v47_v9 = vsub.s32 0, %v46_v5 }
  0x17   :  { %1713 = vmatmul.mubr.msk.bf16.gmra.mrb[8].mxu1 %vm85_vm0, %v37_v11  ;;  %160 = vmatprep.mubr.bf16.mxu0 %v2322_v1  ;;  %v34_v35 = vld [vmem:[%s3105_s0 + $0x38] sm:$0xff]  ;;  %v2646_v43 = vpack.c.bf16 %v331_v31, %v327_v30  ;;  %v330_v44 = vld [vmem:[%s3106_s2 + $0x1b0] sm:$0xff]  ;;  %v333_v46 = vld [vmem:[%s3106_s2 + $0x1c8] sm:$0xff]  ;;  %v2664_v52 = vpack.c.bf16 %v328_v40, %v324_v39  ;;  %v51_v12 = vsub.s32 1, %v46_v5 }
  0x18   :  { %1773 = vmatpush1.bf16.msra.mxu1 %v2586_v16  ;;  %233 = vmatprep.mubr.bf16.mxu1 %v2322_v1  ;;  %v337_v47 = vld [vmem:[%s3106_s2 + $0x1e8] sm:$0xff]  ;;  %v38_v48 = vpack.c.bf16 %v34_v35, %v33_v34  ;;  %v335_v51 = vld [vmem:[%s3106_s2 + $0x1d8] sm:$0xff]  ;;  %v2668_v53 = vpack.c.bf16 %v330_v44, %v326_v42  ;;  %v332_v56 = vld [vmem:[%s3106_s2 + $0x1c0] sm:$0xff] }
  0x19   :  { %1741 = vmatpush1.bf16.msra.mxu0 %v2582_v15  ;;  %1775 = vmatprep.subr.bf16.mxu1 %v2600_v24  ;;  %v339_v1 = vld [vmem:[%s3106_s2 + $0x1f8] sm:$0xff]  ;;  %v2670_v55 = vpack.c.bf16 %v337_v47, %v333_v46  ;;  %v336_v57 = vld [vmem:[%s3106_s2 + $0x1e0] sm:$0xff]  ;;  %v334_v59 = vld [vmem:[%s3106_s2 + $0x1d0] sm:$0xff] }
  0x1a   :  { %1743 = vmatprep.subr.bf16.mxu0 %v2588_v17  ;;  %v2679_v58 = vpack.c.bf16 %v339_v1, %v335_v51  ;;  %v338_v61 = vld [vmem:[%s3106_s2 + $0x1f0] sm:$0xff]  ;;  %v2690_v62 = vpack.c.bf16 %v336_v57, %v332_v56  ;;  %v43_v11 = vld [vmem:[%s3107_s3] sm:$0xf] }
  0x1b   :  { %v2695_v3 = vpack.c.bf16 %v338_v61, %v334_v59  ;;  %v2742_v13 = vrot.slane %v43_v11, %v55_v7  ;;  %v2748_v22 = vrot.slane %v43_v11, %v59_v8  ;;  %v48_v25 = vrot.slane %v43_v11, %v47_v9 }
  0x1c   :  { %1777 = vmatpush1.bf16.msra.mxu1 %v2631_v37  ;;  %v52_v30 = vrot.slane %v43_v11, %v51_v12 }
  0x1d   :  { %1745 = vmatpush1.bf16.msra.mxu0 %v2620_v33  ;;  %1779 = vmatprep.subr.bf16.mxu1 %v2646_v43 }
  0x1e   :  { %1747 = vmatprep.subr.bf16.mxu0 %v2633_v38  ;;  %1710 = vmatmul.mubr.msk.bf16.gmra.mrb[12].mxu0 %vm85_vm0, %v38_v48 }
  0x1f   :  { %1714 = vmatmul.mubr.msk.bf16.gmra.mrb[12].mxu1 %vm85_vm0, %v38_v48  ;;  %410 = vmatprep.mubr.f32.mxu0 %v3111_v63 }
  0x20   :  { %1781 = vmatpush1.bf16.msra.mxu1 %v2668_v53  ;;  %481 = vmatprep.mubr.f32.mxu1 %v3111_v63 }
  0x21   :  { %1749 = vmatpush1.bf16.msra.mxu0 %v2664_v52  ;;  %1783 = vmatprep.subr.bf16.mxu1 %v2679_v58 }
  0x22   :  { %1751 = vmatprep.subr.bf16.mxu0 %v2670_v55 }
  0x24   :  { %1785 = vmatpush1.bf16.msra.mxu1 %v2695_v3 }
  0x25   :  { %1753 = vmatpush1.bf16.msra.mxu0 %v2690_v62  ;;  %1819 = vmatprep.subr.bf16.mxu1 %v2396_v14 }
  0x26   :  { %1787 = vmatprep.subr.bf16.mxu0 %v2385_v10 }
  0x27   :  { %482 = vmatmul.mubr.f32.vlgmr.msra.gmra.mrb[16].mxu1 %v3111_v63 }
  0x28   :  { %411 = vmatmul.mubr.f32.vlgmr.msra.gmra.mrb[16].mxu0 %v3111_v63  ;;  %1821 = vmatpush1.bf16.msra.mxu1 %v2410_v19 }
  0x29   :  { %1789 = vmatpush1.bf16.msra.mxu0 %v2408_v18  ;;  %1823 = vmatprep.subr.bf16.mxu1 %v2436_v27 }
  0x2a   :  { %1791 = vmatprep.subr.bf16.mxu0 %v2423_v23  ;;  %577 = vmatprep.mubr.f32.mxu0 %v3111_v63 }
  0x2b   :  { %648 = vmatprep.mubr.f32.mxu1 %v3111_v63 }
  0x2c   :  { %1825 = vmatpush1.bf16.msra.mxu1 %v2451_v32 }
  0x2d   :  { %1793 = vmatpush1.bf16.msra.mxu0 %v2438_v28  ;;  %1827 = vmatprep.subr.bf16.mxu1 %v2476_v41 }
  0x2e   :  { %1795 = vmatprep.subr.bf16.mxu0 %v2464_v36 }
  0x30   :  { %1829 = vmatpush1.bf16.msra.mxu1 %v2501_v49 }
  0x31   :  { %1797 = vmatpush1.bf16.msra.mxu0 %v2488_v45  ;;  %1831 = vmatprep.subr.bf16.mxu1 %v2515_v54 }
  0x32   :  { %1799 = vmatprep.subr.bf16.mxu0 %v2503_v50 }
  0x34   :  { %1833 = vmatpush1.bf16.msra.mxu1 %v2549_v0 }
  0x35   :  { %1801 = vmatpush1.bf16.msra.mxu0 %v2535_v60  ;;  %1835 = vmatprep.subr.bf16.mxu1 %v2564_v6 }
  0x36   :  { %1803 = vmatprep.subr.bf16.mxu0 %v2551_v2 }
  0x38   :  { %1837 = vmatpush1.bf16.msra.mxu1 %v2586_v16 }
  0x39   :  { %1805 = vmatpush1.bf16.msra.mxu0 %v2582_v15  ;;  %1839 = vmatprep.subr.bf16.mxu1 %v2600_v24 }
  0x3a   :  { %1807 = vmatprep.subr.bf16.mxu0 %v2588_v17 }
  0x3c   :  { %1841 = vmatpush1.bf16.msra.mxu1 %v2631_v37 }
  0x3d   :  { %1809 = vmatpush1.bf16.msra.mxu0 %v2620_v33  ;;  %1843 = vmatprep.subr.bf16.mxu1 %v2646_v43 }
  0x3e   :  { %1811 = vmatprep.subr.bf16.mxu0 %v2633_v38 }
  0x40   :  { %1845 = vmatpush1.bf16.msra.mxu1 %v2668_v53 }
  0x41   :  { %1813 = vmatpush1.bf16.msra.mxu0 %v2664_v52  ;;  %1847 = vmatprep.subr.bf16.mxu1 %v2679_v58 }
  0x42   :  { %1815 = vmatprep.subr.bf16.mxu0 %v2670_v55 }
  0x44   :  { %1849 = vmatpush1.bf16.msra.mxu1 %v2695_v3 }
  0x45   :  { %1817 = vmatpush1.bf16.msra.mxu0 %v2690_v62  ;;  %1883 = vmatprep.subr.bf16.mxu1 %v2396_v14 }
  0x46   :  { %1851 = vmatprep.subr.bf16.mxu0 %v2385_v10 }
  0xd9   :  { %v2744_v20 = vpop.f32.mrb[0].mxu0  ;;  %v2746_v21 = vpop.f32.mrb[0].mxu1 }
  0xda   :  { %v134_v26 = vpop.f32.mrb[1].mxu0  ;;  %v207_v29 = vpop.f32.mrb[1].mxu1 }
  0xdb   :  { %v136_v31 = vpop.f32.mrb[2].mxu0  ;;  %v209_v34 = vpop.f32.mrb[2].mxu1 }
  0xdc   :  { %v2750_v35 = vadd.f32 %v136_v31, %v48_v25  ;;  %v138_v39 = vpop.f32.mrb[3].mxu0  ;;  %v2753_v40 = vadd.f32 %v209_v34, %v2742_v13  ;;  %v211_v42 = vpop.f32.mrb[3].mxu1 }
  0xdd   :  { %v2755_v44 = vadd.f32 %v138_v39, %v52_v30  ;;  %v2758_v46 = vadd.f32 %v211_v42, %v2748_v22 }
  0xe1   :  { %v142_v47 = vpop.f32.mrb[4].mxu0 }
  0xe2   :  { %v215_v48 = vpop.f32.mrb[4].mxu1  ;;  %v2760_v51 = vadd.f32 %v142_v47, %v48_v25  ;;  %v144_v1 = vpop.f32.mrb[5].mxu0 }
  0xe3   :  { %v2763_v56 = vadd.f32 %v215_v48, %v2742_v13  ;;  %v217_v57 = vpop.f32.mrb[5].mxu1  ;;  %v2765_v59 = vadd.f32 %v144_v1, %v52_v30  ;;  %v146_v61 = vpop.f32.mrb[6].mxu0 }
  0xe4   :  { %v2768_v4 = vadd.f32 %v217_v57, %v2748_v22  ;;  %v219_v5 = vpop.f32.mrb[6].mxu1  ;;  %v2770_v7 = vadd.f32 %v146_v61, %v48_v25  ;;  %v148_v8 = vpop.f32.mrb[7].mxu0 }
  0xe5   :  { %v2773_v9 = vadd.f32 %v219_v5, %v2742_v13  ;;  %v221_v11 = vpop.f32.mrb[7].mxu1  ;;  %v2775_v12 = vadd.f32 %v148_v8, %v52_v30 }
  0xe6   :  { %v2778_v31 = vadd.f32 %v221_v11, %v2748_v22 }
  0xe7   :  { %3113 = vst [vmem:[#allocation5_spill] sm:$0xff] %v2773_v9  ;;  %3114 = vst [vmem:[#allocation6_spill] sm:$0xff] %v2775_v12 }
  0xe8   :  { %3115 = vst [vmem:[#allocation7_spill] sm:$0xff] %v2778_v31 }
  0xe9   :  { %v152_v34 = vpop.f32.mrb[8].mxu0 }
  0xea   :  { %v225_v39 = vpop.f32.mrb[8].mxu1  ;;  %v2780_v42 = vadd.f32 %v152_v34, %v48_v25  ;;  %v154_v47 = vpop.f32.mrb[9].mxu0 }
  0xeb   :  { %v2783_v48 = vadd.f32 %v225_v39, %v2742_v13  ;;  %v227_v1 = vpop.f32.mrb[9].mxu1  ;;  %v2785_v57 = vadd.f32 %v154_v47, %v52_v30  ;;  %v156_v61 = vpop.f32.mrb[10].mxu0 }
  0xec   :  { %3116 = vst [vmem:[#allocation8_spill] sm:$0xff] %v2780_v42  ;;  %v2788_v5 = vadd.f32 %v227_v1, %v2748_v22  ;;  %v229_v8 = vpop.f32.mrb[10].mxu1  ;;  %v2790_v63 = vadd.f32 %v156_v61, %v48_v25  ;;  %v158_v11 = vpop.f32.mrb[11].mxu0 }
  0xed   :  { %3117 = vst [vmem:[#allocation9_spill] sm:$0xff] %v2783_v48  ;;  %3118 = vst [vmem:[#allocation10_spill] sm:$0xff] %v2785_v57  ;;  %v2793_v31 = vadd.f32 %v229_v8, %v2742_v13  ;;  %v231_v34 = vpop.f32.mrb[11].mxu1  ;;  %v2795_v42 = vadd.f32 %v158_v11, %v52_v30 }
  0xee   :  { %3119 = vst [vmem:[#allocation11_spill] sm:$0xff] %v2788_v5  ;;  %3120 = vst [vmem:[#allocation12_spill] sm:$0xff] %v2790_v63  ;;  %v2798_v39 = vadd.f32 %v231_v34, %v2748_v22 }
  0xef   :  { %3121 = vst [vmem:[#allocation13_spill] sm:$0xff] %v2793_v31  ;;  %3122 = vst [vmem:[#allocation14_spill] sm:$0xff] %v2795_v42 }
  0xf0   :  { %3123 = vst [vmem:[#allocation15_spill] sm:$0xff] %v2798_v39 }
  0xf1   :  { %v162_v48 = vpop.f32.mrb[12].mxu0 }
  0xf2   :  { %v235_v47 = vpop.f32.mrb[12].mxu1  ;;  %v2800_v57 = vadd.f32 %v162_v48, %v48_v25  ;;  %v164_v12 = vpop.f32.mrb[13].mxu0 }
  0xf3   :  { %v2803_v1 = vadd.f32 %v235_v47, %v2742_v13  ;;  %v237_v61 = vpop.f32.mrb[13].mxu1  ;;  %v2805_v63 = vadd.f32 %v164_v12, %v52_v30  ;;  %v166_v5 = vpop.f32.mrb[14].mxu0  ;;  %v133_v12 = vadd.f32 %v2744_v20, %v48_v25 }
  0xf4   :  { %3124 = vst [vmem:[#allocation16_spill] sm:$0xff] %v2800_v57  ;;  %v2808_v8 = vadd.f32 %v237_v61, %v2748_v22  ;;  %v239_v11 = vpop.f32.mrb[14].mxu1  ;;  %v2810_v42 = vadd.f32 %v166_v5, %v48_v25  ;;  %v168_v34 = vpop.f32.mrb[15].mxu0  ;;  %v206_v61 = vadd.f32 %v2746_v21, %v2742_v13  ;;  %v208_v5 = vadd.f32 %v207_v29, %v2748_v22 }
  0xf5   :  { %3125 = vst [vmem:[#allocation17_spill] sm:$0xff] %v2803_v1  ;;  %3126 = vst [vmem:[#allocation18_spill] sm:$0xff] %v2805_v63  ;;  %v2813_v39 = vadd.f32 %v239_v11, %v2742_v13  ;;  %v241_v48 = vpop.f32.mrb[15].mxu1  ;;  %v2815_v57 = vadd.f32 %v168_v34, %v52_v30  ;;  %v135_v63 = vadd.f32 %v134_v26, %v52_v30 }
  0xf6   :  { %3127 = vst [vmem:[#allocation19_spill] sm:$0xff] %v2808_v8  ;;  %3128 = vst [vmem:[#allocation20_spill] sm:$0xff] %v2810_v42  ;;  %v2818_v47 = vadd.f32 %v241_v48, %v2748_v22 }
  0xf7   :  { %3129 = vst [vmem:[#allocation21_spill] sm:$0xff] %v2813_v39 }
  0xf8   :  { %3130 = vst [vmem:[#allocation22_spill] sm:$0xff] %v2818_v47 }
  0xfa   :  { %v483_v1 = vpop.f32.mrb[16].mxu1 }
  0xfb   :  { %v412_v8 = vpop.f32.mrb[16].mxu0  ;;  %v490_v11 = vadd.f32 %v483_v1, %v206_v61  ;;  %v485_v9 = vpop.f32.mrb[17].mxu1  ;;  %v3131_v1 = vmov 0.0  }
  0xfc   :  { %v488_v42 = vadd.f32 %v412_v8, %v133_v12  ;;  %v414_v31 = vpop.f32.mrb[17].mxu0  ;;  %v491_v34 = vadd.f32 %v485_v9, %v208_v5 }
  0xfd   :  { %v489_v39 = vadd.f32 %v414_v31, %v135_v63 }
  0xfe   :  { %2242 = vtanh.f32 %v488_v42 }
  0xff   :  { %2244 = vtanh.f32 %v489_v39 }
 0x100   :  { %2246 = vtanh.f32 %v490_v11 }
 0x101   :  { %2248 = vtanh.f32 %v491_v34 }
 0x108   :  { %v2243_v48 = vpop.eup %2242 }
 0x109   :  { %v493_v47 = vmul.f32 0.5, %v2243_v48  ;;  %v2245_v20 = vpop.eup %2244 }
 0x10a   :  { %v496_v26 = vmul.f32 0.5, %v2245_v20  ;;  %v2247_v13 = vpop.eup %2246 }
 0x10b   :  { %v494_v25 = vadd.f32 0.5, %v493_v47  ;;  %v2249_v63 = vpop.eup %2248 }
 0x10c   :  { %v497_v21 = vadd.f32 0.5, %v496_v26  ;;  %v500_v31 = vmul.f32 0.5, %v2249_v63 }
 0x10d   :  { %v503_v30 = vmul.f32 %v2247_v13, %v494_v25 }
 0x10e   :  { %v502_v22 = vmul.f32 0.0, %v497_v21  ;;  %v501_v42 = vadd.f32 0.5, %v500_v31 }
 0x110   :  { %v2824_v29 = vadd.f32 %v503_v30, %v502_v22 }
 0x112   :  { %2250 = vtanh.f32 %v2824_v29 }
 0x11c   :  { %v2251_v9 = vpop.eup %2250 }
 0x11d   :  { %v506_v39 = vmul.f32 %v2251_v9, %v501_v42 }
 0x11f   :  { %507 = vst [vmem:[%s3108_s4] sm:$0xff] %v506_v39  ;;  %578 = vmatmul.mubr.f32.vlgmr.msra.gmra.mrb[18].mxu0 %v506_v39  ;;  %649 = vmatmul.mubr.f32.vlgmr.msra.gmra.mrb[18].mxu1 %v506_v39 }
 0x120   :  { %1853 = vmatpush1.bf16.msra.mxu0 %v2408_v18  ;;  %1885 = vmatpush1.bf16.msra.mxu1 %v2410_v19 }
 0x121   :  { %1855 = vmatprep.subr.bf16.mxu0 %v2423_v23  ;;  %1887 = vmatprep.subr.bf16.mxu1 %v2436_v27 }
 0x122   :  { %745 = vmatprep.mubr.f32.mxu0 %v3131_v1  ;;  %816 = vmatprep.mubr.f32.mxu1 %v3131_v1 }
 0x124   :  { %1857 = vmatpush1.bf16.msra.mxu0 %v2438_v28  ;;  %1889 = vmatpush1.bf16.msra.mxu1 %v2451_v32 }
 0x125   :  { %1859 = vmatprep.subr.bf16.mxu0 %v2464_v36  ;;  %1891 = vmatprep.subr.bf16.mxu1 %v2476_v41 }
 0x128   :  { %1861 = vmatpush1.bf16.msra.mxu0 %v2488_v45  ;;  %1893 = vmatpush1.bf16.msra.mxu1 %v2501_v49 }
 0x129   :  { %1863 = vmatprep.subr.bf16.mxu0 %v2503_v50  ;;  %1895 = vmatprep.subr.bf16.mxu1 %v2515_v54 }
 0x12c   :  { %1865 = vmatpush1.bf16.msra.mxu0 %v2535_v60  ;;  %1897 = vmatpush1.bf16.msra.mxu1 %v2549_v0 }
 0x12d   :  { %1867 = vmatprep.subr.bf16.mxu0 %v2551_v2  ;;  %1899 = vmatprep.subr.bf16.mxu1 %v2564_v6 }
 0x130   :  { %1869 = vmatpush1.bf16.msra.mxu0 %v2582_v15  ;;  %1901 = vmatpush1.bf16.msra.mxu1 %v2586_v16 }
 0x131   :  { %1871 = vmatprep.subr.bf16.mxu0 %v2588_v17  ;;  %1903 = vmatprep.subr.bf16.mxu1 %v2600_v24 }
 0x134   :  { %1873 = vmatpush1.bf16.msra.mxu0 %v2620_v33  ;;  %1905 = vmatpush1.bf16.msra.mxu1 %v2631_v37 }
 0x135   :  { %1875 = vmatprep.subr.bf16.mxu0 %v2633_v38  ;;  %1907 = vmatprep.subr.bf16.mxu1 %v2646_v43 }
 0x138   :  { %1877 = vmatpush1.bf16.msra.mxu0 %v2664_v52  ;;  %1909 = vmatpush1.bf16.msra.mxu1 %v2668_v53 }
 0x139   :  { %1879 = vmatprep.subr.bf16.mxu0 %v2670_v55  ;;  %1911 = vmatprep.subr.bf16.mxu1 %v2679_v58 }
 0x13c   :  { %1881 = vmatpush1.bf16.msra.mxu0 %v2690_v62  ;;  %1913 = vmatpush1.bf16.msra.mxu1 %v2695_v3 }
 0x13d   :  { %1915 = vmatprep.subr.bf16.mxu0 %v2385_v10  ;;  %1947 = vmatprep.subr.bf16.mxu1 %v2396_v14 }
 0x1f2   :  { %v579_v8 = vpop.f32.mrb[18].mxu0  ;;  %v650_v47 = vpop.f32.mrb[18].mxu1 }
 0x1f3   :  { %v655_v12 = vadd.f32 %v579_v8, %v2750_v35  ;;  %v657_v61 = vadd.f32 %v650_v47, %v2753_v40  ;;  %v581_v5 = vpop.f32.mrb[19].mxu0  ;;  %v652_v11 = vpop.f32.mrb[19].mxu1 }
 0x1f4   :  { %v656_v34 = vadd.f32 %v581_v5, %v2755_v44  ;;  %v658_v48 = vadd.f32 %v652_v11, %v2758_v46 }
 0x1f5   :  { %2252 = vtanh.f32 %v655_v12 }
 0x1f6   :  { %2254 = vtanh.f32 %v656_v34 }
 0x1f7   :  { %2256 = vtanh.f32 %v657_v61 }
 0x1f8   :  { %2258 = vtanh.f32 %v658_v48 }
 0x1ff   :  { %v2253_v20 = vpop.eup %2252 }
 0x200   :  { %v660_v25 = vmul.f32 0.5, %v2253_v20  ;;  %v2255_v26 = vpop.eup %2254 }
 0x201   :  { %v663_v21 = vmul.f32 0.5, %v2255_v26  ;;  %v2257_v30 = vpop.eup %2256 }
 0x202   :  { %v661_v13 = vadd.f32 0.5, %v660_v25  ;;  %v2259_v44 = vpop.eup %2258 }
 0x203   :  { %v664_v22 = vadd.f32 0.5, %v663_v21  ;;  %v667_v46 = vmul.f32 0.5, %v2259_v44 }
 0x204   :  { %v670_v35 = vmul.f32 %v2257_v30, %v661_v13 }
 0x205   :  { %v669_v40 = vmul.f32 %v664_v22, %v2824_v29  ;;  %v668_v31 = vadd.f32 0.5, %v667_v46 }
 0x207   :  { %v2869_v63 = vadd.f32 %v670_v35, %v669_v40 }
 0x209   :  { %2260 = vtanh.f32 %v2869_v63 }
 0x213   :  { %v2261_v42 = vpop.eup %2260 }
 0x214   :  { %v673_v9 = vmul.f32 %v2261_v42, %v668_v31  ;;  %v3132_v31 = vld [vmem:[#allocation5_spill] sm:$0xff] }
 0x216   :  { %1715 = vst [vmem:[%s3108_s4 + $0x8] sm:$0xff] %v673_v9  ;;  %746 = vmatmul.mubr.f32.vlgmr.msra.gmra.mrb[20].mxu0 %v673_v9  ;;  %817 = vmatmul.mubr.f32.vlgmr.msra.gmra.mrb[20].mxu1 %v673_v9 }
 0x217   :  { %1917 = vmatpush1.bf16.msra.mxu0 %v2408_v18  ;;  %1949 = vmatpush1.bf16.msra.mxu1 %v2410_v19 }
 0x218   :  { %1919 = vmatprep.subr.bf16.mxu0 %v2423_v23  ;;  %1951 = vmatprep.subr.bf16.mxu1 %v2436_v27 }
 0x219   :  { %913 = vmatprep.mubr.f32.mxu0 %v3131_v1  ;;  %984 = vmatprep.mubr.f32.mxu1 %v3131_v1 }
 0x21b   :  { %1921 = vmatpush1.bf16.msra.mxu0 %v2438_v28  ;;  %1953 = vmatpush1.bf16.msra.mxu1 %v2451_v32 }
 0x21c   :  { %1923 = vmatprep.subr.bf16.mxu0 %v2464_v36  ;;  %1955 = vmatprep.subr.bf16.mxu1 %v2476_v41 }
 0x21f   :  { %1925 = vmatpush1.bf16.msra.mxu0 %v2488_v45  ;;  %1957 = vmatpush1.bf16.msra.mxu1 %v2501_v49 }
 0x220   :  { %1927 = vmatprep.subr.bf16.mxu0 %v2503_v50  ;;  %1959 = vmatprep.subr.bf16.mxu1 %v2515_v54 }
 0x223   :  { %1929 = vmatpush1.bf16.msra.mxu0 %v2535_v60  ;;  %1961 = vmatpush1.bf16.msra.mxu1 %v2549_v0 }
 0x224   :  { %1931 = vmatprep.subr.bf16.mxu0 %v2551_v2  ;;  %1963 = vmatprep.subr.bf16.mxu1 %v2564_v6 }
 0x227   :  { %1933 = vmatpush1.bf16.msra.mxu0 %v2582_v15  ;;  %1965 = vmatpush1.bf16.msra.mxu1 %v2586_v16 }
 0x228   :  { %1935 = vmatprep.subr.bf16.mxu0 %v2588_v17  ;;  %1967 = vmatprep.subr.bf16.mxu1 %v2600_v24 }
 0x22b   :  { %1937 = vmatpush1.bf16.msra.mxu0 %v2620_v33  ;;  %1969 = vmatpush1.bf16.msra.mxu1 %v2631_v37 }
 0x22c   :  { %1939 = vmatprep.subr.bf16.mxu0 %v2633_v38  ;;  %1971 = vmatprep.subr.bf16.mxu1 %v2646_v43 }
 0x22f   :  { %1941 = vmatpush1.bf16.msra.mxu0 %v2664_v52  ;;  %1973 = vmatpush1.bf16.msra.mxu1 %v2668_v53 }
 0x230   :  { %1943 = vmatprep.subr.bf16.mxu0 %v2670_v55  ;;  %1975 = vmatprep.subr.bf16.mxu1 %v2679_v58 }
 0x233   :  { %1945 = vmatpush1.bf16.msra.mxu0 %v2690_v62  ;;  %1977 = vmatpush1.bf16.msra.mxu1 %v2695_v3 }
 0x234   :  { %1979 = vmatprep.subr.bf16.mxu0 %v2385_v10  ;;  %2011 = vmatprep.subr.bf16.mxu1 %v2396_v14 }
 0x2e9   :  { %v747_v29 = vpop.f32.mrb[20].mxu0  ;;  %v818_v39 = vpop.f32.mrb[20].mxu1 }
 0x2ea   :  { %v823_v8 = vadd.f32 %v747_v29, %v2760_v51  ;;  %v825_v47 = vadd.f32 %v818_v39, %v2763_v56  ;;  %v749_v12 = vpop.f32.mrb[21].mxu0  ;;  %v820_v61 = vpop.f32.mrb[21].mxu1  ;;  %v3133_v39 = vld [vmem:[#allocation6_spill] sm:$0xff] }
 0x2eb   :  { %v824_v5 = vadd.f32 %v749_v12, %v2765_v59  ;;  %v826_v11 = vadd.f32 %v820_v61, %v2768_v4 }
 0x2ec   :  { %2262 = vtanh.f32 %v823_v8 }
 0x2ed   :  { %2264 = vtanh.f32 %v824_v5 }
 0x2ee   :  { %2266 = vtanh.f32 %v825_v47  ;;  %v3134_v47 = vld [vmem:[#allocation7_spill] sm:$0xff] }
 0x2ef   :  { %2268 = vtanh.f32 %v826_v11 }
 0x2f6   :  { %v2263_v34 = vpop.eup %2262 }
 0x2f7   :  { %v828_v48 = vmul.f32 0.5, %v2263_v34  ;;  %v2265_v20 = vpop.eup %2264 }
 0x2f8   :  { %v831_v26 = vmul.f32 0.5, %v2265_v20  ;;  %v2267_v13 = vpop.eup %2266 }
 0x2f9   :  { %v829_v25 = vadd.f32 0.5, %v828_v48  ;;  %v2269_v59 = vpop.eup %2268 }
 0x2fa   :  { %v832_v21 = vadd.f32 0.5, %v831_v26  ;;  %v835_v4 = vmul.f32 0.5, %v2269_v59 }
 0x2fb   :  { %v838_v51 = vmul.f32 %v2267_v13, %v829_v25 }
 0x2fc   :  { %v837_v56 = vmul.f32 %v832_v21, %v2869_v63  ;;  %v836_v22 = vadd.f32 0.5, %v835_v4 }
 0x2fe   :  { %v2914_v30 = vadd.f32 %v838_v51, %v837_v56 }
 0x300   :  { %2270 = vtanh.f32 %v2914_v30 }
 0x30a   :  { %v2271_v35 = vpop.eup %2270 }
 0x30b   :  { %v841_v40 = vmul.f32 %v2271_v35, %v836_v22  ;;  %v3135_v35 = vld [vmem:[#allocation8_spill] sm:$0xff] }
 0x30d   :  { %1716 = vst [vmem:[%s3108_s4 + $0x10] sm:$0xff] %v841_v40  ;;  %914 = vmatmul.mubr.f32.vlgmr.msra.gmra.mrb[22].mxu0 %v841_v40  ;;  %985 = vmatmul.mubr.f32.vlgmr.msra.gmra.mrb[22].mxu1 %v841_v40 }
 0x30e   :  { %1981 = vmatpush1.bf16.msra.mxu0 %v2408_v18  ;;  %2013 = vmatpush1.bf16.msra.mxu1 %v2410_v19 }
 0x30f   :  { %1983 = vmatprep.subr.bf16.mxu0 %v2423_v23  ;;  %2015 = vmatprep.subr.bf16.mxu1 %v2436_v27 }
 0x310   :  { %1081 = vmatprep.mubr.f32.mxu0 %v3131_v1  ;;  %1152 = vmatprep.mubr.f32.mxu1 %v3131_v1 }
 0x312   :  { %1985 = vmatpush1.bf16.msra.mxu0 %v2438_v28  ;;  %2017 = vmatpush1.bf16.msra.mxu1 %v2451_v32 }
 0x313   :  { %1987 = vmatprep.subr.bf16.mxu0 %v2464_v36  ;;  %2019 = vmatprep.subr.bf16.mxu1 %v2476_v41 }
 0x316   :  { %1989 = vmatpush1.bf16.msra.mxu0 %v2488_v45  ;;  %2021 = vmatpush1.bf16.msra.mxu1 %v2501_v49 }
 0x317   :  { %1991 = vmatprep.subr.bf16.mxu0 %v2503_v50  ;;  %2023 = vmatprep.subr.bf16.mxu1 %v2515_v54 }
 0x31a   :  { %1993 = vmatpush1.bf16.msra.mxu0 %v2535_v60  ;;  %2025 = vmatpush1.bf16.msra.mxu1 %v2549_v0 }
 0x31b   :  { %1995 = vmatprep.subr.bf16.mxu0 %v2551_v2  ;;  %2027 = vmatprep.subr.bf16.mxu1 %v2564_v6 }
 0x31e   :  { %1997 = vmatpush1.bf16.msra.mxu0 %v2582_v15  ;;  %2029 = vmatpush1.bf16.msra.mxu1 %v2586_v16 }
 0x31f   :  { %1999 = vmatprep.subr.bf16.mxu0 %v2588_v17  ;;  %2031 = vmatprep.subr.bf16.mxu1 %v2600_v24 }
 0x322   :  { %2001 = vmatpush1.bf16.msra.mxu0 %v2620_v33  ;;  %2033 = vmatpush1.bf16.msra.mxu1 %v2631_v37 }
 0x323   :  { %2003 = vmatprep.subr.bf16.mxu0 %v2633_v38  ;;  %2035 = vmatprep.subr.bf16.mxu1 %v2646_v43 }
 0x326   :  { %2005 = vmatpush1.bf16.msra.mxu0 %v2664_v52  ;;  %2037 = vmatpush1.bf16.msra.mxu1 %v2668_v53 }
 0x327   :  { %2007 = vmatprep.subr.bf16.mxu0 %v2670_v55  ;;  %2039 = vmatprep.subr.bf16.mxu1 %v2679_v58 }
 0x32a   :  { %2009 = vmatpush1.bf16.msra.mxu0 %v2690_v62  ;;  %2041 = vmatpush1.bf16.msra.mxu1 %v2695_v3 }
 0x32b   :  { %2043 = vmatprep.subr.bf16.mxu0 %v2385_v10  ;;  %2075 = vmatprep.subr.bf16.mxu1 %v2396_v14 }
 0x3e0   :  { %v915_v63 = vpop.f32.mrb[22].mxu0  ;;  %v986_v44 = vpop.f32.mrb[22].mxu1 }
 0x3e1   :  { %v991_v46 = vadd.f32 %v915_v63, %v2770_v7  ;;  %v993_v42 = vadd.f32 %v986_v44, %v3132_v31  ;;  %v917_v9 = vpop.f32.mrb[23].mxu0  ;;  %v988_v29 = vpop.f32.mrb[23].mxu1  ;;  %v3136_v63 = vld [vmem:[#allocation9_spill] sm:$0xff] }
 0x3e2   :  { %v992_v8 = vadd.f32 %v917_v9, %v3133_v39  ;;  %v994_v12 = vadd.f32 %v988_v29, %v3134_v47  ;;  %v3138_v29 = vld [vmem:[#allocation11_spill] sm:$0xff] }
 0x3e3   :  { %2272 = vtanh.f32 %v991_v46 }
 0x3e4   :  { %2274 = vtanh.f32 %v992_v8 }
 0x3e5   :  { %2276 = vtanh.f32 %v993_v42  ;;  %v3137_v42 = vld [vmem:[#allocation10_spill] sm:$0xff] }
 0x3e6   :  { %2278 = vtanh.f32 %v994_v12 }
 0x3ed   :  { %v2273_v61 = vpop.eup %2272 }
 0x3ee   :  { %v996_v5 = vmul.f32 0.5, %v2273_v61  ;;  %v2275_v11 = vpop.eup %2274 }
 0x3ef   :  { %v999_v48 = vmul.f32 0.5, %v2275_v11  ;;  %v2277_v20 = vpop.eup %2276 }
 0x3f0   :  { %v997_v34 = vadd.f32 0.5, %v996_v5  ;;  %v2279_v21 = vpop.eup %2278 }
 0x3f1   :  { %v1000_v25 = vadd.f32 0.5, %v999_v48  ;;  %v1003_v51 = vmul.f32 0.5, %v2279_v21 }
 0x3f2   :  { %v1006_v7 = vmul.f32 %v2277_v20, %v997_v34 }
 0x3f3   :  { %v1005_v26 = vmul.f32 %v1000_v25, %v2914_v30  ;;  %v1004_v56 = vadd.f32 0.5, %v1003_v51 }
 0x3f5   :  { %v2959_v13 = vadd.f32 %v1006_v7, %v1005_v26 }
 0x3f7   :  { %2280 = vtanh.f32 %v2959_v13 }
 0x401   :  { %v2281_v59 = vpop.eup %2280 }
 0x402   :  { %v1009_v4 = vmul.f32 %v2281_v59, %v1004_v56 }
 0x404   :  { %1717 = vst [vmem:[%s3108_s4 + $0x18] sm:$0xff] %v1009_v4  ;;  %1082 = vmatmul.mubr.f32.vlgmr.msra.gmra.mrb[24].mxu0 %v1009_v4  ;;  %1153 = vmatmul.mubr.f32.vlgmr.msra.gmra.mrb[24].mxu1 %v1009_v4  ;;  %v3139_v4 = vld [vmem:[#allocation12_spill] sm:$0xff] }
 0x405   :  { %2045 = vmatpush1.bf16.msra.mxu0 %v2408_v18  ;;  %2077 = vmatpush1.bf16.msra.mxu1 %v2410_v19 }
 0x406   :  { %2047 = vmatprep.subr.bf16.mxu0 %v2423_v23  ;;  %2079 = vmatprep.subr.bf16.mxu1 %v2436_v27 }
 0x407   :  { %1249 = vmatprep.mubr.f32.mxu0 %v3131_v1  ;;  %1320 = vmatprep.mubr.f32.mxu1 %v3131_v1 }
 0x409   :  { %2049 = vmatpush1.bf16.msra.mxu0 %v2438_v28  ;;  %2081 = vmatpush1.bf16.msra.mxu1 %v2451_v32 }
 0x40a   :  { %2051 = vmatprep.subr.bf16.mxu0 %v2464_v36  ;;  %2083 = vmatprep.subr.bf16.mxu1 %v2476_v41 }
 0x40d   :  { %2053 = vmatpush1.bf16.msra.mxu0 %v2488_v45  ;;  %2085 = vmatpush1.bf16.msra.mxu1 %v2501_v49 }
 0x40e   :  { %2055 = vmatprep.subr.bf16.mxu0 %v2503_v50  ;;  %2087 = vmatprep.subr.bf16.mxu1 %v2515_v54 }
 0x411   :  { %2057 = vmatpush1.bf16.msra.mxu0 %v2535_v60  ;;  %2089 = vmatpush1.bf16.msra.mxu1 %v2549_v0 }
 0x412   :  { %2059 = vmatprep.subr.bf16.mxu0 %v2551_v2  ;;  %2091 = vmatprep.subr.bf16.mxu1 %v2564_v6 }
 0x415   :  { %2061 = vmatpush1.bf16.msra.mxu0 %v2582_v15  ;;  %2093 = vmatpush1.bf16.msra.mxu1 %v2586_v16 }
 0x416   :  { %2063 = vmatprep.subr.bf16.mxu0 %v2588_v17  ;;  %2095 = vmatprep.subr.bf16.mxu1 %v2600_v24 }
 0x419   :  { %2065 = vmatpush1.bf16.msra.mxu0 %v2620_v33  ;;  %2097 = vmatpush1.bf16.msra.mxu1 %v2631_v37 }
 0x41a   :  { %2067 = vmatprep.subr.bf16.mxu0 %v2633_v38  ;;  %2099 = vmatprep.subr.bf16.mxu1 %v2646_v43 }
 0x41d   :  { %2069 = vmatpush1.bf16.msra.mxu0 %v2664_v52  ;;  %2101 = vmatpush1.bf16.msra.mxu1 %v2668_v53 }
 0x41e   :  { %2071 = vmatprep.subr.bf16.mxu0 %v2670_v55  ;;  %2103 = vmatprep.subr.bf16.mxu1 %v2679_v58 }
 0x421   :  { %2073 = vmatpush1.bf16.msra.mxu0 %v2690_v62  ;;  %2105 = vmatpush1.bf16.msra.mxu1 %v2695_v3 }
 0x422   :  { %2107 = vmatprep.subr.bf16.mxu0 %v2385_v10  ;;  %2139 = vmatprep.subr.bf16.mxu1 %v2396_v14 }
 0x4d7   :  { %v1083_v30 = vpop.f32.mrb[24].mxu0  ;;  %v1154_v22 = vpop.f32.mrb[24].mxu1 }
 0x4d8   :  { %v1159_v40 = vadd.f32 %v1083_v30, %v3135_v35  ;;  %v1161_v44 = vadd.f32 %v1154_v22, %v3136_v63  ;;  %v1085_v46 = vpop.f32.mrb[25].mxu0  ;;  %v1156_v31 = vpop.f32.mrb[25].mxu1  ;;  %v3140_v22 = vld [vmem:[#allocation13_spill] sm:$0xff] }
 0x4d9   :  { %v1160_v9 = vadd.f32 %v1085_v46, %v3137_v42  ;;  %v1162_v39 = vadd.f32 %v1156_v31, %v3138_v29  ;;  %v3142_v31 = vld [vmem:[#allocation15_spill] sm:$0xff] }
 0x4da   :  { %2282 = vtanh.f32 %v1159_v40 }
 0x4db   :  { %2284 = vtanh.f32 %v1160_v9 }
 0x4dc   :  { %2286 = vtanh.f32 %v1161_v44  ;;  %v3141_v44 = vld [vmem:[#allocation14_spill] sm:$0xff] }
 0x4dd   :  { %2288 = vtanh.f32 %v1162_v39 }
 0x4e4   :  { %v2283_v8 = vpop.eup %2282 }
 0x4e5   :  { %v1164_v47 = vmul.f32 0.5, %v2283_v8  ;;  %v2285_v12 = vpop.eup %2284 }
 0x4e6   :  { %v1167_v5 = vmul.f32 0.5, %v2285_v12  ;;  %v2287_v11 = vpop.eup %2286 }
 0x4e7   :  { %v1165_v61 = vadd.f32 0.5, %v1164_v47  ;;  %v2289_v7 = vpop.eup %2288 }
 0x4e8   :  { %v1168_v34 = vadd.f32 0.5, %v1167_v5  ;;  %v1171_v26 = vmul.f32 0.5, %v2289_v7 }
 0x4e9   :  { %v1174_v48 = vmul.f32 %v2287_v11, %v1165_v61 }
 0x4ea   :  { %v1173_v20 = vmul.f32 %v1168_v34, %v2959_v13  ;;  %v1172_v21 = vadd.f32 0.5, %v1171_v26 }
 0x4ec   :  { %v3004_v25 = vadd.f32 %v1174_v48, %v1173_v20 }
 0x4ee   :  { %2290 = vtanh.f32 %v3004_v25 }
 0x4f8   :  { %v2291_v51 = vpop.eup %2290 }
 0x4f9   :  { %v1177_v56 = vmul.f32 %v2291_v51, %v1172_v21 }
 0x4fb   :  { %1718 = vst [vmem:[%s3108_s4 + $0x20] sm:$0xff] %v1177_v56  ;;  %1250 = vmatmul.mubr.f32.vlgmr.msra.gmra.mrb[26].mxu0 %v1177_v56  ;;  %1321 = vmatmul.mubr.f32.vlgmr.msra.gmra.mrb[26].mxu1 %v1177_v56 }
 0x4fc   :  { %2109 = vmatpush1.bf16.msra.mxu0 %v2408_v18  ;;  %2141 = vmatpush1.bf16.msra.mxu1 %v2410_v19 }
 0x4fd   :  { %2111 = vmatprep.subr.bf16.mxu0 %v2423_v23  ;;  %2143 = vmatprep.subr.bf16.mxu1 %v2436_v27 }
 0x4fe   :  { %1417 = vmatprep.mubr.f32.mxu0 %v3131_v1  ;;  %1488 = vmatprep.mubr.f32.mxu1 %v3131_v1 }
 0x500   :  { %2113 = vmatpush1.bf16.msra.mxu0 %v2438_v28  ;;  %2145 = vmatpush1.bf16.msra.mxu1 %v2451_v32 }
 0x501   :  { %2115 = vmatprep.subr.bf16.mxu0 %v2464_v36  ;;  %2147 = vmatprep.subr.bf16.mxu1 %v2476_v41 }
 0x504   :  { %2117 = vmatpush1.bf16.msra.mxu0 %v2488_v45  ;;  %2149 = vmatpush1.bf16.msra.mxu1 %v2501_v49 }
 0x505   :  { %2119 = vmatprep.subr.bf16.mxu0 %v2503_v50  ;;  %2151 = vmatprep.subr.bf16.mxu1 %v2515_v54 }
 0x508   :  { %2121 = vmatpush1.bf16.msra.mxu0 %v2535_v60  ;;  %2153 = vmatpush1.bf16.msra.mxu1 %v2549_v0 }
 0x509   :  { %2123 = vmatprep.subr.bf16.mxu0 %v2551_v2  ;;  %2155 = vmatprep.subr.bf16.mxu1 %v2564_v6 }
 0x50c   :  { %2125 = vmatpush1.bf16.msra.mxu0 %v2582_v15  ;;  %2157 = vmatpush1.bf16.msra.mxu1 %v2586_v16 }
 0x50d   :  { %2127 = vmatprep.subr.bf16.mxu0 %v2588_v17  ;;  %2159 = vmatprep.subr.bf16.mxu1 %v2600_v24 }
 0x510   :  { %2129 = vmatpush1.bf16.msra.mxu0 %v2620_v33  ;;  %2161 = vmatpush1.bf16.msra.mxu1 %v2631_v37 }
 0x511   :  { %2131 = vmatprep.subr.bf16.mxu0 %v2633_v38  ;;  %2163 = vmatprep.subr.bf16.mxu1 %v2646_v43 }
 0x514   :  { %2133 = vmatpush1.bf16.msra.mxu0 %v2664_v52  ;;  %2165 = vmatpush1.bf16.msra.mxu1 %v2668_v53 }
 0x515   :  { %2135 = vmatprep.subr.bf16.mxu0 %v2670_v55  ;;  %2167 = vmatprep.subr.bf16.mxu1 %v2679_v58 }
 0x518   :  { %2137 = vmatpush1.bf16.msra.mxu0 %v2690_v62  ;;  %2169 = vmatpush1.bf16.msra.mxu1 %v2695_v3 }
 0x519   :  { %2171 = vmatprep.subr.bf16.mxu0 %v2385_v10  ;;  %2203 = vmatprep.subr.bf16.mxu1 %v2396_v14 }
 0x5ce   :  { %v1251_v13 = vpop.f32.mrb[26].mxu0  ;;  %v1322_v59 = vpop.f32.mrb[26].mxu1 }
 0x5cf   :  { %v1327_v30 = vadd.f32 %v1251_v13, %v3139_v4  ;;  %v1329_v35 = vadd.f32 %v1322_v59, %v3140_v22  ;;  %v1253_v40 = vpop.f32.mrb[27].mxu0  ;;  %v1324_v63 = vpop.f32.mrb[27].mxu1  ;;  %v3149_v13 = vld [vmem:[#allocation22_spill] sm:$0xff] }
 0x5d0   :  { %v1328_v46 = vadd.f32 %v1253_v40, %v3141_v44  ;;  %v1330_v42 = vadd.f32 %v1324_v63, %v3142_v31 }
 0x5d1   :  { %2292 = vtanh.f32 %v1327_v30 }
 0x5d2   :  { %2294 = vtanh.f32 %v1328_v46 }
 0x5d3   :  { %2296 = vtanh.f32 %v1329_v35 }
 0x5d4   :  { %2298 = vtanh.f32 %v1330_v42 }
 0x5db   :  { %v2293_v9 = vpop.eup %2292 }
 0x5dc   :  { %v1332_v29 = vmul.f32 0.5, %v2293_v9  ;;  %v2295_v10 = vpop.eup %2294 }
 0x5dd   :  { %v1335_v14 = vmul.f32 0.5, %v2295_v10  ;;  %v2297_v8 = vpop.eup %2296 }
 0x5de   :  { %v1333_v39 = vadd.f32 0.5, %v1332_v29  ;;  %v2299_v11 = vpop.eup %2298 }
 0x5df   :  { %v1336_v47 = vadd.f32 0.5, %v1335_v14  ;;  %v1339_v34 = vmul.f32 0.5, %v2299_v11 }
 0x5e0   :  { %v1342_v12 = vmul.f32 %v2297_v8, %v1333_v39 }
 0x5e1   :  { %v1341_v61 = vmul.f32 %v1336_v47, %v3004_v25  ;;  %v1340_v48 = vadd.f32 0.5, %v1339_v34  ;;  %v3148_v25 = vld [vmem:[#allocation21_spill] sm:$0xff] }
 0x5e3   :  { %v1343_v5 = vadd.f32 %v1342_v12, %v1341_v61 }
 0x5e5   :  { %2300 = vtanh.f32 %v1343_v5 }
 0x5ef   :  { %v2301_v20 = vpop.eup %2300 }
 0x5f0   :  { %v1345_v7 = vmul.f32 %v2301_v20, %v1340_v48 }
 0x5f2   :  { %1719 = vst [vmem:[%s3108_s4 + $0x28] sm:$0xff] %v1345_v7  ;;  %1418 = vmatmul.mubr.f32.vlgmr.msra.gmra.mrb[28].mxu0 %v1345_v7  ;;  %1489 = vmatmul.mubr.f32.vlgmr.msra.gmra.mrb[28].mxu1 %v1345_v7 }
 0x5f3   :  { %2173 = vmatpush1.bf16.msra.mxu0 %v2408_v18  ;;  %2205 = vmatpush1.bf16.msra.mxu1 %v2410_v19 }
 0x5f4   :  { %2175 = vmatprep.subr.bf16.mxu0 %v2423_v23  ;;  %2207 = vmatprep.subr.bf16.mxu1 %v2436_v27  ;;  %v3143_v23 = vld [vmem:[#allocation16_spill] sm:$0xff] }
 0x5f5   :  { %1585 = vmatprep.mubr.f32.mxu0 %v3131_v1  ;;  %1656 = vmatprep.mubr.f32.mxu1 %v3131_v1 }
 0x5f7   :  { %2177 = vmatpush1.bf16.msra.mxu0 %v2438_v28  ;;  %2209 = vmatpush1.bf16.msra.mxu1 %v2451_v32  ;;  %v3144_v28 = vld [vmem:[#allocation17_spill] sm:$0xff] }
 0x5f8   :  { %2179 = vmatprep.subr.bf16.mxu0 %v2464_v36  ;;  %2211 = vmatprep.subr.bf16.mxu1 %v2476_v41 }
 0x5fb   :  { %2181 = vmatpush1.bf16.msra.mxu0 %v2488_v45  ;;  %2213 = vmatpush1.bf16.msra.mxu1 %v2501_v49  ;;  %v3145_v45 = vld [vmem:[#allocation18_spill] sm:$0xff] }
 0x5fc   :  { %2183 = vmatprep.subr.bf16.mxu0 %v2503_v50  ;;  %2215 = vmatprep.subr.bf16.mxu1 %v2515_v54  ;;  %v3146_v50 = vld [vmem:[#allocation19_spill] sm:$0xff] }
 0x5ff   :  { %2185 = vmatpush1.bf16.msra.mxu0 %v2535_v60  ;;  %2217 = vmatpush1.bf16.msra.mxu1 %v2549_v0 }
 0x600   :  { %2187 = vmatprep.subr.bf16.mxu0 %v2551_v2  ;;  %2219 = vmatprep.subr.bf16.mxu1 %v2564_v6 }
 0x603   :  { %2189 = vmatpush1.bf16.msra.mxu0 %v2582_v15  ;;  %2221 = vmatpush1.bf16.msra.mxu1 %v2586_v16 }
 0x604   :  { %2191 = vmatprep.subr.bf16.mxu0 %v2588_v17  ;;  %2223 = vmatprep.subr.bf16.mxu1 %v2600_v24 }
 0x607   :  { %2193 = vmatpush1.bf16.msra.mxu0 %v2620_v33  ;;  %2225 = vmatpush1.bf16.msra.mxu1 %v2631_v37 }
 0x608   :  { %2195 = vmatprep.subr.bf16.mxu0 %v2633_v38  ;;  %2227 = vmatprep.subr.bf16.mxu1 %v2646_v43 }
 0x60b   :  { %2197 = vmatpush1.bf16.msra.mxu0 %v2664_v52  ;;  %2229 = vmatpush1.bf16.msra.mxu1 %v2668_v53 }
 0x60c   :  { %2199 = vmatprep.subr.bf16.mxu0 %v2670_v55  ;;  %2231 = vmatprep.subr.bf16.mxu1 %v2679_v58 }
 0x60f   :  { %2201 = vmatpush1.bf16.msra.mxu0 %v2690_v62  ;;  %2233 = vmatpush1.bf16.msra.mxu1 %v2695_v3  ;;  %v3147_v3 = vld [vmem:[#allocation20_spill] sm:$0xff] }
 0x6c5   :  { %v1419_v18 = vpop.f32.mrb[28].mxu0  ;;  %v1490_v19 = vpop.f32.mrb[28].mxu1 }
 0x6c6   :  { %v1495_v27 = vadd.f32 %v1419_v18, %v3143_v23  ;;  %v1497_v32 = vadd.f32 %v1490_v19, %v3144_v28  ;;  %v1421_v36 = vpop.f32.mrb[29].mxu0  ;;  %v1492_v41 = vpop.f32.mrb[29].mxu1 }
 0x6c7   :  { %v1496_v49 = vadd.f32 %v1421_v36, %v3145_v45  ;;  %v1498_v54 = vadd.f32 %v1492_v41, %v3146_v50 }
 0x6c8   :  { %2302 = vtanh.f32 %v1495_v27 }
 0x6c9   :  { %2304 = vtanh.f32 %v1496_v49 }
 0x6ca   :  { %2306 = vtanh.f32 %v1497_v32 }
 0x6cb   :  { %2308 = vtanh.f32 %v1498_v54 }
 0x6d2   :  { %v2303_v60 = vpop.eup %2302 }
 0x6d3   :  { %v1500_v0 = vmul.f32 0.5, %v2303_v60  ;;  %v2305_v2 = vpop.eup %2304 }
 0x6d4   :  { %v1503_v15 = vmul.f32 0.5, %v2305_v2  ;;  %v2307_v16 = vpop.eup %2306 }
 0x6d5   :  { %v1501_v6 = vadd.f32 0.5, %v1500_v0  ;;  %v2309_v38 = vpop.eup %2308 }
 0x6d6   :  { %v1504_v17 = vadd.f32 0.5, %v1503_v15  ;;  %v1507_v43 = vmul.f32 0.5, %v2309_v38 }
 0x6d7   :  { %v1510_v24 = vmul.f32 %v2307_v16, %v1501_v6 }
 0x6d8   :  { %v1509_v33 = vmul.f32 %v1504_v17, %v1343_v5  ;;  %v1508_v52 = vadd.f32 0.5, %v1507_v43 }
 0x6da   :  { %v1511_v37 = vadd.f32 %v1510_v24, %v1509_v33 }
 0x6dc   :  { %2310 = vtanh.f32 %v1511_v37 }
 0x6e6   :  { %v2311_v53 = vpop.eup %2310 }
 0x6e7   :  { %v1513_v55 = vmul.f32 %v2311_v53, %v1508_v52 }
 0x6e9   :  { %1720 = vst [vmem:[%s3108_s4 + $0x30] sm:$0xff] %v1513_v55  ;;  %1586 = vmatmul.mubr.f32.vlgmr.msra.gmra.mrb[30].mxu0 %v1513_v55  ;;  %1657 = vmatmul.mubr.f32.vlgmr.msra.gmra.mrb[30].mxu1 %v1513_v55 }
 0x7bc   :  { %v1587_v58 = vpop.f32.mrb[30].mxu0  ;;  %v1658_v62 = vpop.f32.mrb[30].mxu1 }
 0x7bd   :  { %v1663_v1 = vadd.f32 %v1587_v58, %v3147_v3  ;;  %v1665_v26 = vadd.f32 %v1658_v62, %v3148_v25  ;;  %v1589_v21 = vpop.f32.mrb[31].mxu0  ;;  %v1660_v51 = vpop.f32.mrb[31].mxu1 }
 0x7be   :  { %v1664_v56 = vadd.f32 %v1589_v21, %v2815_v57  ;;  %v1666_v59 = vadd.f32 %v1660_v51, %v3149_v13 }
 0x7bf   :  { %2312 = vtanh.f32 %v1663_v1 }
 0x7c0   :  { %2314 = vtanh.f32 %v1664_v56 }
 0x7c1   :  { %2316 = vtanh.f32 %v1665_v26 }
 0x7c2   :  { %2318 = vtanh.f32 %v1666_v59 }
 0x7c9   :  { %v2313_v4 = vpop.eup %2312 }
 0x7ca   :  { %v1668_v30 = vmul.f32 0.5, %v2313_v4  ;;  %v2315_v22 = vpop.eup %2314 }
 0x7cb   :  { %v1671_v40 = vmul.f32 0.5, %v2315_v22  ;;  %v2317_v63 = vpop.eup %2316 }
 0x7cc   :  { %v1669_v35 = vadd.f32 0.5, %v1668_v30  ;;  %v2319_v57 = vpop.eup %2318 }
 0x7cd   :  { %v1672_v44 = vadd.f32 0.5, %v1671_v40  ;;  %v1675_v9 = vmul.f32 0.5, %v2319_v57 }
 0x7ce   :  { %v1678_v46 = vmul.f32 %v2317_v63, %v1669_v35 }
 0x7cf   :  { %v1677_v31 = vmul.f32 %v1672_v44, %v1511_v37  ;;  %v1676_v29 = vadd.f32 0.5, %v1675_v9 }
 0x7d1   :  { %v1679_v42 = vadd.f32 %v1678_v46, %v1677_v31 }
 0x7d3   :  { %2320 = vtanh.f32 %v1679_v42  ;;  %1690 = vst [vmem:[%s3109_s6] sm:$0xff] %v1679_v42 }
 0x7dd   :  { %v2321_v10 = vpop.eup %2320 }
 0x7de   :  { %v1681_v39 = vmul.f32 %v2321_v10, %v1676_v29 }
 0x7e0   :  { %1721 = vst [vmem:[%s3108_s4 + $0x38] sm:$0xff] %v1681_v39  ;;  %1689 = vst [vmem:[%s3110_s5] sm:$0xff] %v1681_v39 }

</bundles_post_ra>
